<compile_context>
chip_gen: v5e
topology: v5e:2x2
jax: 0.10.0
libtpu: 0.0.40
codegen_flags: <defaults>
</compile_context>

<pallas_src>
import math

import jax
import jax.numpy as jnp
from jax.experimental import pallas as pl
from jax.experimental.pallas import tpu as pltpu

GN_EPS = 1e-5
W_DTYPE = jnp.bfloat16


# ----------------------------------------------------------------------------- kernel
def _make_kernel(num_heads, ch_per_head, t_total, t_q, inv_group_n, eps, use_bf16_exp):
    f32 = jnp.float32
    single_tile = (t_q == t_total)

    def kernel(x_ref, gdn_ref, gup_ref, gamma_ref, beta_ref, wqkv_ref, wp_ref, bp_ref,
               o_ref, hcat_ref):
        # ---- GroupNorm stats over the full (C, T) slab ----
        # (recomputed per query tile; pure VPU work, negligible next to the matmuls)
        xf = x_ref[...].astype(f32)                               # (C, T)
        s1 = jnp.sum(xf, axis=1, keepdims=True)                   # (C, 1)
        s2 = jnp.sum(xf * xf, axis=1, keepdims=True)              # (C, 1)
        gdn = gdn_ref[...]                                        # (G, C)  group membership
        gup = gup_ref[...]                                        # (C, G)
        mean = jnp.dot(gup, jnp.dot(gdn, s1, preferred_element_type=f32),
                       preferred_element_type=f32) * inv_group_n  # (C, 1)
        ex2 = jnp.dot(gup, jnp.dot(gdn, s2, preferred_element_type=f32),
                      preferred_element_type=f32) * inv_group_n
        # single-pass variance; clamp guards E[x^2]-mean^2 cancellation at large DC offsets
        var = jnp.maximum(ex2 - mean * mean, 0.0)
        scale_c = jax.lax.rsqrt(var + eps) * gamma_ref[...]       # (C, 1)
        shift_c = beta_ref[...] - mean * scale_c                  # xn = x*scale + shift
        xn = (xf * scale_c + shift_c).astype(W_DTYPE)             # (C, T) bf16 for the MXU

        q_start = pl.multiple_of(pl.program_id(1) * t_q, t_q)
        if single_tile:
            x_q = xf                                              # residual slice == full slab
            xn_q = xn
        else:
            x_q = x_ref[:, pl.ds(q_start, t_q)].astype(f32)       # (C, TQ)
            xn_q = (x_q * scale_c + shift_c).astype(W_DTYPE)

        # ---- per-head qkv + attention; heads packed into a (C, TQ) bf16 scratch ----
        # TODO(synk): for very large T (>~ 8k pixels) also tile the key/value axis with an
        #             online-softmax (flash) loop; at the feature-map sizes this block is
        #             used at, keys/values for one head fit comfortably in VMEM.
        # NOTE: ch_per_head should be a multiple of 16 (bf16 sublane pack) to keep the
        #       static weight/scratch slices relayout-free.
        for h in range(num_heads):
            base = 3 * ch_per_head * h
            hbase = ch_per_head * h
            wq = wqkv_ref[base:base + ch_per_head, :]
            wk = wqkv_ref[base + ch_per_head:base + 2 * ch_per_head, :]
            wv = wqkv_ref[base + 2 * ch_per_head:base + 3 * ch_per_head, :]

            # q only over this query tile; k/v over all T keys (q/k scale folded in weights)
            q = jnp.dot(wq, xn_q, preferred_element_type=f32).astype(W_DTYPE)   # (Ch, TQ)
            k = jnp.dot(wk, xn, preferred_element_type=f32).astype(W_DTYPE)     # (Ch, T)
            v = jnp.dot(wv, xn, preferred_element_type=f32).astype(W_DTYPE)     # (Ch, T)

            # scores[s, t] = sum_c k[c, s] * q[c, t]  (keys on sublanes, queries on lanes):
            # PV then is a plain jnp.dot (no (T,T)-scale transpose) and the softmax sums are
            # already (1, TQ) rows for the deferred normalization.
            s = jnp.einsum("cs,ct->st", k, q, preferred_element_type=f32)       # (T, TQ)
            m = jnp.max(s, axis=0, keepdims=True)                               # (1, TQ)
            if use_bf16_exp:
                p = jnp.exp((s - m).astype(W_DTYPE))           # bf16 EUP on v6e/v7x
                l = jnp.sum(p.astype(f32), axis=0, keepdims=True)               # (1, TQ)
            else:
                p_f = jnp.exp(s - m)                           # f32 EUP (v5e and older)
                l = jnp.sum(p_f, axis=0, keepdims=True)
                p = p_f.astype(W_DTYPE)

            pv = jnp.dot(v, p, preferred_element_type=f32)                      # (Ch, TQ)
            # deferred softmax normalization: (Ch, TQ) multiply instead of (T, TQ).
            # approx reciprocal (~1e-3 rel err) is fine at bf16-weight precision.
            inv_l = pl.reciprocal(l, approx=True)
            hcat_ref[hbase:hbase + ch_per_head, :] = (pv * inv_l).astype(W_DTYPE)

        # ---- 1x1 proj (full contraction-depth matmul over packed heads) + bias + residual
        y = jnp.dot(wp_ref[...], hcat_ref[...], preferred_element_type=f32) + bp_ref[...]
        o_ref[...] = (y + x_q).astype(o_ref.dtype)

    return kernel


# ----------------------------------------------------------------------------- helpers
def _pick_tq(t):
    """Query-tile size: single tile for small maps, 512/256/128 divisors otherwise."""
    if t <= 512:
        return t
    for cand in (512, 256, 128):
        if t % cand == 0:
            return cand
    return t   # TODO(synk): non-128-divisible spatial sizes fall back to a single tile


def _device_supports_bf16_eup():
    try:
        kind = jax.devices()[0].device_kind.lower()
    except Exception:
        return False
    # v5 and earlier have no bf16 EUP/VPU; bf16 exp would only add casts there.
    return not any(tag in kind for tag in ("v2", "v3", "v4", "v5"))


def _vmem_limit_bytes(C, T, TQ, groups, num_heads, x_itemsize, out_itemsize):
    Ch = C // num_heads
    est = (
        2 * C * T * x_itemsize            # input block, double-buffered
        + 2 * C * TQ * out_itemsize       # output block, double-buffered
        + 4 * C * C * 2                   # wqkv + wp, bf16, single-buffered
        + (2 * C * groups + 3 * C) * 4    # group matrices + gamma/beta/bias
        + C * T * 4                       # x cast to f32
        + C * T * 2                       # normalized x (bf16)
        + C * TQ * 2                      # packed-head scratch
        + 2 * Ch * T * 2 + Ch * TQ * 2    # per-head k, v, q (bf16)
        + T * TQ * 4                      # score tile (f32)
        + T * TQ * 2                      # probabilities (bf16)
        + 2 * C * TQ * 4                  # proj accumulator + residual slice (f32)
    )
    try:
        cap = int(pltpu.get_tpu_info().vmem_capacity_bytes)   # 128 MiB v5e/v6e, 64 MiB v7x
    except Exception:
        cap = 64 * 1024 * 1024                                # v7x-safe fallback
    return min(cap, max(32 * 1024 * 1024, int(est * 1.4)))


# ----------------------------------------------------------------------------- wrapper
def attention_block(x_nchw, params, *, num_heads=1, groups=32, eps=GN_EPS, tq=None):
    B, C, H, W = x_nchw.shape
    assert C % num_heads == 0 and C % groups == 0
    T = H * W
    TQ = tq if tq is not None else _pick_tq(T)
    assert T % TQ == 0
    NQ = T // TQ
    Ch = C // num_heads
    # pure reshape: channels on sublanes, pixels on lanes; bf16 x is accepted as-is
    # (residual/accumulation stay f32 in-kernel), halving HBM traffic if the model is bf16.
    x = x_nchw.reshape(B, C, T)

    kernel = _make_kernel(num_heads, Ch, T, TQ, 1.0 / float(T * (C // groups)), eps,
                          _device_supports_bf16_eup())

    # Constant weights: whole array resident in VMEM once, no per-step double-buffering.
    const = pl.BlockSpec(memory_space=pltpu.MemorySpace.VMEM)

    flops = B * NQ * (num_heads * (2 * Ch * C * (2 * T + TQ) + 4 * Ch * T * TQ)
                      + 2 * C * C * TQ)
    transcendentals = B * NQ * num_heads * T * TQ
    bytes_accessed = (2 * x.size * x.dtype.itemsize
                      + 4 * C * C * 2 + (2 * C * groups + 3 * C) * 4)

    out = pl.pallas_call(
        kernel,
        grid=(B, NQ),
        in_specs=[
            # full (C, T) slab; block index independent of qi -> DMA'd once per batch element
            pl.BlockSpec((None, C, T), lambda b, qi: (b, 0, 0)),
            const,    # g_down  (G, C)
            const,    # g_up    (C, G)
            const,    # gamma   (C, 1)
            const,    # beta    (C, 1)
            const,    # wqkv    (3C, C) bf16, q/k scale folded
            const,    # wp      (C, C)  bf16
            const,    # bp      (C, 1)
        ],
        out_specs=pl.BlockSpec((None, C, TQ), lambda b, qi: (b, 0, qi)),
        out_shape=jax.ShapeDtypeStruct((B, C, T), x_nchw.dtype),
        scratch_shapes=[pltpu.VMEM((C, TQ), W_DTYPE)],   # packed heads before the proj
        compiler_params=pltpu.CompilerParams(
            dimension_semantics=("parallel", "parallel"),
            vmem_limit_bytes=_vmem_limit_bytes(C, T, TQ, groups, num_heads,
                                               x.dtype.itemsize, x.dtype.itemsize),
        ),
        cost_estimate=pl.CostEstimate(flops=int(flops),
                                      transcendentals=int(transcendentals),
                                      bytes_accessed=int(bytes_accessed)),
    )(x, params["g_down"], params["g_up"], params["gamma"], params["beta"],
      params["wqkv"], params["wp"], params["bp"])

    return out.reshape(B, C, H, W)


# ----------------------------------------------------------------------------- params
def init_params(key, channels, *, num_heads=1, groups=32, weight_dtype=W_DTYPE):
    assert channels % num_heads == 0 and channels % groups == 0
    C = channels
    Ch = C // num_heads
    k1, k2, k3, k4, k5 = jax.random.split(key, 5)

    # PyTorch layouts: Conv2d(C, 3C, 1, bias=False).weight -> (3C, C); Conv2d(C, C, 1) -> (C, C), (C,)
    wqkv = 0.1 * jax.random.normal(k1, (3 * C, C), dtype=jnp.float32)
    wp = 0.1 * jax.random.normal(k2, (C, C), dtype=jnp.float32)
    bp = 0.05 * jax.random.normal(k3, (C,), dtype=jnp.float32)
    gamma = 1.0 + 0.1 * jax.random.normal(k4, (C,), dtype=jnp.float32)
    beta = 0.1 * jax.random.normal(k5, (C,), dtype=jnp.float32)

    ref = dict(wqkv=wqkv, wp=wp, bp=bp, gamma=gamma, beta=beta)

    # Fold the 1/sqrt(sqrt(C/nh)) scaling of q and k into the qkv weight rows (exact: no bias).
    scale = float(Ch) ** (-0.25)
    r = jnp.arange(3 * C) % (3 * Ch)
    row_scale = jnp.where(r < 2 * Ch, scale, 1.0).astype(jnp.float32)

    # Small (G, C) / (C, G) group membership matrices (replaces the old (C, C) indicator).
    gid = jnp.arange(C) // (C // groups)
    g_down = (jnp.arange(groups)[:, None] == gid[None, :]).astype(jnp.float32)   # (G, C)
    g_up = (gid[:, None] == jnp.arange(groups)[None, :]).astype(jnp.float32)     # (C, G)

    kernel_params = dict(
        wqkv=(wqkv * row_scale[:, None]).astype(weight_dtype),
        wp=wp.astype(weight_dtype),
        bp=bp.reshape(C, 1),
        gamma=gamma.reshape(C, 1),
        beta=beta.reshape(C, 1),
        g_down=g_down,
        g_up=g_up,
    )
    return kernel_params, ref


# ----------------------------------------------------------------------------- pure-JAX reference
def attention_block_reference(x_nchw, ref_params, *, num_heads=1, groups=32, eps=GN_EPS):
    B, C, H, W = x_nchw.shape
    T = H * W
    x = x_nchw.astype(jnp.float32)
    xg = x.reshape(B, groups, C // groups, H, W)
    mean = jnp.mean(xg, axis=(2, 3, 4), keepdims=True)
    var = jnp.var(xg, axis=(2, 3, 4), keepdims=True)
    xn = ((xg - mean) * jax.lax.rsqrt(var + eps)).reshape(B, C, H, W)
    xn = xn * ref_params["gamma"].reshape(1, C, 1, 1) + ref_params["beta"].reshape(1, C, 1, 1)

    qkv = jnp.einsum("oc,bchw->bohw", ref_params["wqkv"], xn)
    qkv = qkv.reshape(B * num_heads, 3 * (C // num_heads), T)
    q, k, v = jnp.split(qkv, 3, axis=1)
    scale = 1.0 / math.sqrt(math.sqrt(C // num_heads))
    attn = jnp.einsum("bct,bcs->bts", q * scale, k * scale)
    attn = jax.nn.softmax(attn, axis=-1)
    h = jnp.einsum("bts,bcs->bct", attn, v).reshape(B, C, H, W)
    h = jnp.einsum("oc,bchw->bohw", ref_params["wp"], h) + ref_params["bp"].reshape(1, C, 1, 1)
    return h + x


if __name__ == "__main__":
    key = jax.random.PRNGKey(0)
    kx1, kp1, kx2, kp2 = jax.random.split(key, 4)

    # Config 1: module defaults (GroupNorm(32, C) -> C % 32 == 0), single head, single q tile.
    B, C, H, W = 2, 32, 16, 16
    x = jax.random.normal(kx1, (B, C, H, W), dtype=jnp.float32)   # NCHW like PyTorch
    params, ref_params = init_params(kp1, C, num_heads=1, groups=32)
    out = jax.block_until_ready(attention_block(x, params, num_heads=1, groups=32))
    assert out.shape == (B, C, H, W), out.shape
    assert bool(jnp.all(jnp.isfinite(out)))
    ref = attention_block_reference(x, ref_params, num_heads=1, groups=32)
    err = float(jnp.max(jnp.abs(out - ref)))
    assert err < 5e-2, f"config1 max abs err vs f32 reference: {err}"

    # Config 2: exercises multi-head + query-tile grid (TQ < T) code paths.
    B2, C2, H2, W2 = 1, 64, 16, 16
    x2 = jax.random.normal(kx2, (B2, C2, H2, W2), dtype=jnp.float32)
    params2, ref_params2 = init_params(kp2, C2, num_heads=2, groups=32)
    out2 = jax.block_until_ready(
        attention_block(x2, params2, num_heads=2, groups=32, tq=128))
    ref2 = attention_block_reference(x2, ref_params2, num_heads=2, groups=32)
    err2 = float(jnp.max(jnp.abs(out2 - ref2)))
    assert err2 < 5e-2, f"config2 max abs err vs f32 reference: {err2}"

    print("KERNEL_OK")
</pallas_src>

<mosaic_0001>
module attributes {stable_mosaic.version = 11 : i64} {
  func.func @kernel(%arg0: i32, %arg1: i32, %arg2: memref<1x32x256xf32, #tpu.memory_space<vmem>>, %arg3: memref<32x32xf32, #tpu.memory_space<vmem>>, %arg4: memref<32x32xf32, #tpu.memory_space<vmem>>, %arg5: memref<32x1xf32, #tpu.memory_space<vmem>>, %arg6: memref<32x1xf32, #tpu.memory_space<vmem>>, %arg7: memref<96x32xbf16, #tpu.memory_space<vmem>>, %arg8: memref<32x32xbf16, #tpu.memory_space<vmem>>, %arg9: memref<32x1xf32, #tpu.memory_space<vmem>>, %arg10: memref<1x32x256xf32, #tpu.memory_space<vmem>>, %arg11: memref<32x256xbf16, #tpu.memory_space<vmem>>) attributes {dimension_semantics = [#tpu.dimension_semantics<parallel>, #tpu.dimension_semantics<parallel>], iteration_bounds = array<i64: 2, 1>, scalar_prefetch = 0 : i64, scratch_operands = 1 : i64, tpu.core_type = #tpu.core_type<tc>, window_params = [{transform_indices = @transform_0, window_bounds = array<i64: 1, 32, 256>}, {pipeline_mode = #tpu.pipeline_mode<synchronous>, transform_indices = @transform_1, window_bounds = array<i64: 32, 32>}, {pipeline_mode = #tpu.pipeline_mode<synchronous>, transform_indices = @transform_2, window_bounds = array<i64: 32, 32>}, {pipeline_mode = #tpu.pipeline_mode<synchronous>, transform_indices = @transform_3, window_bounds = array<i64: 32, 1>}, {pipeline_mode = #tpu.pipeline_mode<synchronous>, transform_indices = @transform_4, window_bounds = array<i64: 32, 1>}, {pipeline_mode = #tpu.pipeline_mode<synchronous>, transform_indices = @transform_5, window_bounds = array<i64: 96, 32>}, {pipeline_mode = #tpu.pipeline_mode<synchronous>, transform_indices = @transform_6, window_bounds = array<i64: 32, 32>}, {pipeline_mode = #tpu.pipeline_mode<synchronous>, transform_indices = @transform_7, window_bounds = array<i64: 32, 1>}, {transform_indices = @transform_8, window_bounds = array<i64: 1, 32, 256>}]} {
    %c0 = arith.constant 0 : index
    %c0_0 = arith.constant 0 : index
    %c0_1 = arith.constant 0 : index
    %0 = vector.load %arg2[%c0, %c0_0, %c0_1] : memref<1x32x256xf32, #tpu.memory_space<vmem>>, vector<1x32x256xf32>
    %1 = vector.shape_cast %0 : vector<1x32x256xf32> to vector<32x256xf32>
    %cst = arith.constant dense<0.000000e+00> : vector<32xf32>
    %2 = vector.multi_reduction <add>, %1, %cst [1] : vector<32x256xf32> to vector<32xf32>
    %3 = vector.shape_cast %2 : vector<32xf32> to vector<32x1xf32>
    %4 = arith.mulf %1, %1 : vector<32x256xf32>
    %cst_2 = arith.constant dense<0.000000e+00> : vector<32xf32>
    %5 = vector.multi_reduction <add>, %4, %cst_2 [1] : vector<32x256xf32> to vector<32xf32>
    %6 = vector.shape_cast %5 : vector<32xf32> to vector<32x1xf32>
    %c0_3 = arith.constant 0 : index
    %c0_4 = arith.constant 0 : index
    %7 = vector.load %arg3[%c0_3, %c0_4] : memref<32x32xf32, #tpu.memory_space<vmem>>, vector<32x32xf32>
    %c0_5 = arith.constant 0 : index
    %c0_6 = arith.constant 0 : index
    %8 = vector.load %arg4[%c0_5, %c0_6] : memref<32x32xf32, #tpu.memory_space<vmem>>, vector<32x32xf32>
    %cst_7 = arith.constant dense<0.000000e+00> : vector<32x1xf32>
    %9 = tpu.matmul %7, %3, %cst_7 {dimension_numbers = #tpu.dot_dimension_numbers<[1], [0], [0], [1], [0, 0, 1, 1], [], []>} : vector<32x32xf32>, vector<32x1xf32>, vector<32x1xf32> -> vector<32x1xf32>
    %cst_8 = arith.constant dense<0.000000e+00> : vector<32x1xf32>
    %10 = tpu.matmul %8, %9, %cst_8 {dimension_numbers = #tpu.dot_dimension_numbers<[1], [0], [0], [1], [0, 0, 1, 1], [], []>} : vector<32x32xf32>, vector<32x1xf32>, vector<32x1xf32> -> vector<32x1xf32>
    %cst_9 = arith.constant 3.906250e-03 : f32
    %11 = vector.broadcast %cst_9 : f32 to vector<32x1xf32>
    %12 = arith.mulf %10, %11 : vector<32x1xf32>
    %cst_10 = arith.constant dense<0.000000e+00> : vector<32x1xf32>
    %13 = tpu.matmul %7, %6, %cst_10 {dimension_numbers = #tpu.dot_dimension_numbers<[1], [0], [0], [1], [0, 0, 1, 1], [], []>} : vector<32x32xf32>, vector<32x1xf32>, vector<32x1xf32> -> vector<32x1xf32>
    %cst_11 = arith.constant dense<0.000000e+00> : vector<32x1xf32>
    %14 = tpu.matmul %8, %13, %cst_11 {dimension_numbers = #tpu.dot_dimension_numbers<[1], [0], [0], [1], [0, 0, 1, 1], [], []>} : vector<32x32xf32>, vector<32x1xf32>, vector<32x1xf32> -> vector<32x1xf32>
    %cst_12 = arith.constant 3.906250e-03 : f32
    %15 = vector.broadcast %cst_12 : f32 to vector<32x1xf32>
    %16 = arith.mulf %14, %15 : vector<32x1xf32>
    %17 = arith.mulf %12, %12 : vector<32x1xf32>
    %18 = arith.subf %16, %17 : vector<32x1xf32>
    %cst_13 = arith.constant 0.000000e+00 : f32
    %19 = vector.broadcast %cst_13 : f32 to vector<32x1xf32>
    %20 = arith.maximumf %18, %19 : vector<32x1xf32>
    %cst_14 = arith.constant 9.99999974E-6 : f32
    %21 = vector.broadcast %cst_14 : f32 to vector<32x1xf32>
    %22 = arith.addf %20, %21 : vector<32x1xf32>
    %23 = math.rsqrt %22 : vector<32x1xf32>
    %c0_15 = arith.constant 0 : index
    %c0_16 = arith.constant 0 : index
    %24 = vector.load %arg5[%c0_15, %c0_16] : memref<32x1xf32, #tpu.memory_space<vmem>>, vector<32x1xf32>
    %25 = arith.mulf %23, %24 : vector<32x1xf32>
    %c0_17 = arith.constant 0 : index
    %c0_18 = arith.constant 0 : index
    %26 = vector.load %arg6[%c0_17, %c0_18] : memref<32x1xf32, #tpu.memory_space<vmem>>, vector<32x1xf32>
    %27 = arith.mulf %12, %25 : vector<32x1xf32>
    %28 = arith.subf %26, %27 : vector<32x1xf32>
    %29 = vector.broadcast %25 : vector<32x1xf32> to vector<32x256xf32>
    %30 = arith.mulf %1, %29 : vector<32x256xf32>
    %31 = vector.broadcast %28 : vector<32x1xf32> to vector<32x256xf32>
    %32 = arith.addf %30, %31 : vector<32x256xf32>
    %33 = arith.truncf %32 : vector<32x256xf32> to vector<32x256xbf16>
    %c0_19 = arith.constant 0 : index
    %c0_20 = arith.constant 0 : index
    %34 = vector.load %arg7[%c0_19, %c0_20] : memref<96x32xbf16, #tpu.memory_space<vmem>>, vector<32x32xbf16>
    %c32 = arith.constant 32 : index
    %c0_21 = arith.constant 0 : index
    %35 = vector.load %arg7[%c32, %c0_21] : memref<96x32xbf16, #tpu.memory_space<vmem>>, vector<32x32xbf16>
    %c64 = arith.constant 64 : index
    %c0_22 = arith.constant 0 : index
    %36 = vector.load %arg7[%c64, %c0_22] : memref<96x32xbf16, #tpu.memory_space<vmem>>, vector<32x32xbf16>
    %cst_23 = arith.constant dense<0.000000e+00> : vector<32x256xf32>
    %37 = tpu.matmul %34, %33, %cst_23 {dimension_numbers = #tpu.dot_dimension_numbers<[1], [0], [0], [1], [0, 0, 1, 1], [], []>} : vector<32x32xbf16>, vector<32x256xbf16>, vector<32x256xf32> -> vector<32x256xf32>
    %38 = arith.truncf %37 : vector<32x256xf32> to vector<32x256xbf16>
    %cst_24 = arith.constant dense<0.000000e+00> : vector<32x256xf32>
    %39 = tpu.matmul %35, %33, %cst_24 {dimension_numbers = #tpu.dot_dimension_numbers<[1], [0], [0], [1], [0, 0, 1, 1], [], []>} : vector<32x32xbf16>, vector<32x256xbf16>, vector<32x256xf32> -> vector<32x256xf32>
    %40 = arith.truncf %39 : vector<32x256xf32> to vector<32x256xbf16>
    %cst_25 = arith.constant dense<0.000000e+00> : vector<32x256xf32>
    %41 = tpu.matmul %36, %33, %cst_25 {dimension_numbers = #tpu.dot_dimension_numbers<[1], [0], [0], [1], [0, 0, 1, 1], [], []>} : vector<32x32xbf16>, vector<32x256xbf16>, vector<32x256xf32> -> vector<32x256xf32>
    %42 = arith.truncf %41 : vector<32x256xf32> to vector<32x256xbf16>
    "tpu.trace_start"() <{level = 10 : i32, message = "cs,ct->st"}> : () -> ()
    %cst_26 = arith.constant dense<0.000000e+00> : vector<256x256xf32>
    %43 = tpu.matmul %40, %38, %cst_26 {dimension_numbers = #tpu.dot_dimension_numbers<[0], [0], [1], [1], [0, 1, 1, 1], [], []>} : vector<32x256xbf16>, vector<32x256xbf16>, vector<256x256xf32> -> vector<256x256xf32>
    "tpu.trace_stop"() : () -> ()
    %cst_27 = arith.constant dense<0xFF800000> : vector<256xf32>
    %44 = vector.multi_reduction <maximumf>, %43, %cst_27 [0] : vector<256x256xf32> to vector<256xf32>
    %45 = vector.shape_cast %44 : vector<256xf32> to vector<1x256xf32>
    %46 = vector.broadcast %45 : vector<1x256xf32> to vector<256x256xf32>
    %47 = arith.subf %43, %46 : vector<256x256xf32>
    %48 = arith.truncf %47 : vector<256x256xf32> to vector<256x256xbf16>
    %49 = math.exp %48 : vector<256x256xbf16>
    %50 = arith.extf %49 : vector<256x256xbf16> to vector<256x256xf32>
    %cst_28 = arith.constant dense<0.000000e+00> : vector<256xf32>
    %51 = vector.multi_reduction <add>, %50, %cst_28 [0] : vector<256x256xf32> to vector<256xf32>
    %52 = vector.shape_cast %51 : vector<256xf32> to vector<1x256xf32>
    %cst_29 = arith.constant dense<0.000000e+00> : vector<32x256xf32>
    %53 = tpu.matmul %42, %49, %cst_29 {dimension_numbers = #tpu.dot_dimension_numbers<[1], [0], [0], [1], [0, 0, 1, 1], [], []>} : vector<32x256xbf16>, vector<256x256xbf16>, vector<32x256xf32> -> vector<32x256xf32>
    %54 = tpu.reciprocal %52 {approx = true} : vector<1x256xf32> -> vector<1x256xf32>
    %55 = vector.broadcast %54 : vector<1x256xf32> to vector<32x256xf32>
    %56 = arith.mulf %53, %55 : vector<32x256xf32>
    %57 = arith.truncf %56 : vector<32x256xf32> to vector<32x256xbf16>
    %c0_30 = arith.constant 0 : index
    %c0_31 = arith.constant 0 : index
    %58 = vector.load %arg11[%c0_30, %c0_31] : memref<32x256xbf16, #tpu.memory_space<vmem>>, vector<32x256xbf16>
    tpu.vector_store %arg11[%c0_30, %c0_31], %57 {strides = array<i32>} : memref<32x256xbf16, #tpu.memory_space<vmem>>, vector<32x256xbf16>,
    %c0_32 = arith.constant 0 : index
    %c0_33 = arith.constant 0 : index
    %59 = vector.load %arg8[%c0_32, %c0_33] : memref<32x32xbf16, #tpu.memory_space<vmem>>, vector<32x32xbf16>
    %c0_34 = arith.constant 0 : index
    %c0_35 = arith.constant 0 : index
    %60 = vector.load %arg11[%c0_34, %c0_35] : memref<32x256xbf16, #tpu.memory_space<vmem>>, vector<32x256xbf16>
    %cst_36 = arith.constant dense<0.000000e+00> : vector<32x256xf32>
    %61 = tpu.matmul %59, %60, %cst_36 {dimension_numbers = #tpu.dot_dimension_numbers<[1], [0], [0], [1], [0, 0, 1, 1], [], []>} : vector<32x32xbf16>, vector<32x256xbf16>, vector<32x256xf32> -> vector<32x256xf32>
    %c0_37 = arith.constant 0 : index
    %c0_38 = arith.constant 0 : index
    %62 = vector.load %arg9[%c0_37, %c0_38] : memref<32x1xf32, #tpu.memory_space<vmem>>, vector<32x1xf32>
    %63 = vector.broadcast %62 : vector<32x1xf32> to vector<32x256xf32>
    %64 = arith.addf %61, %63 : vector<32x256xf32>
    %65 = arith.addf %64, %1 : vector<32x256xf32>
    %c0_39 = arith.constant 0 : index
    %c0_40 = arith.constant 0 : index
    %c0_41 = arith.constant 0 : index
    %66 = vector.load %arg10[%c0_39, %c0_40, %c0_41] : memref<1x32x256xf32, #tpu.memory_space<vmem>>, vector<1x32x256xf32>
    %67 = vector.shape_cast %66 : vector<1x32x256xf32> to vector<32x256xf32>
    %68 = vector.shape_cast %65 : vector<32x256xf32> to vector<1x32x256xf32>
    tpu.vector_store %arg10[%c0_39, %c0_40, %c0_41], %68 {strides = array<i32>} : memref<1x32x256xf32, #tpu.memory_space<vmem>>, vector<1x32x256xf32>,
    return
  }
  func.func @transform_0(%arg0: i32, %arg1: i32) -> (i32, i32, i32) {
    %c0_i32 = arith.constant 0 : i32
    %c0_i32_0 = arith.constant 0 : i32
    %c0_i32_1 = arith.constant 0 : i32
    return %arg0, %c0_i32, %c0_i32_0 : i32, i32, i32
  }
  func.func @transform_1(%arg0: i32, %arg1: i32) -> (i32, i32) {
    %c0_i32 = arith.constant 0 : i32
    %c0_i32_0 = arith.constant 0 : i32
    %c0_i32_1 = arith.constant 0 : i32
    return %c0_i32, %c0_i32_0 : i32, i32
  }
  func.func @transform_2(%arg0: i32, %arg1: i32) -> (i32, i32) {
    %c0_i32 = arith.constant 0 : i32
    %c0_i32_0 = arith.constant 0 : i32
    %c0_i32_1 = arith.constant 0 : i32
    return %c0_i32, %c0_i32_0 : i32, i32
  }
  func.func @transform_3(%arg0: i32, %arg1: i32) -> (i32, i32) {
    %c0_i32 = arith.constant 0 : i32
    %c0_i32_0 = arith.constant 0 : i32
    %c0_i32_1 = arith.constant 0 : i32
    return %c0_i32, %c0_i32_0 : i32, i32
  }
  func.func @transform_4(%arg0: i32, %arg1: i32) -> (i32, i32) {
    %c0_i32 = arith.constant 0 : i32
    %c0_i32_0 = arith.constant 0 : i32
    %c0_i32_1 = arith.constant 0 : i32
    return %c0_i32, %c0_i32_0 : i32, i32
  }
  func.func @transform_5(%arg0: i32, %arg1: i32) -> (i32, i32) {
    %c0_i32 = arith.constant 0 : i32
    %c0_i32_0 = arith.constant 0 : i32
    %c0_i32_1 = arith.constant 0 : i32
    return %c0_i32, %c0_i32_0 : i32, i32
  }
  func.func @transform_6(%arg0: i32, %arg1: i32) -> (i32, i32) {
    %c0_i32 = arith.constant 0 : i32
    %c0_i32_0 = arith.constant 0 : i32
    %c0_i32_1 = arith.constant 0 : i32
    return %c0_i32, %c0_i32_0 : i32, i32
  }
  func.func @transform_7(%arg0: i32, %arg1: i32) -> (i32, i32) {
    %c0_i32 = arith.constant 0 : i32
    %c0_i32_0 = arith.constant 0 : i32
    %c0_i32_1 = arith.constant 0 : i32
    return %c0_i32, %c0_i32_0 : i32, i32
  }
  func.func @transform_8(%arg0: i32, %arg1: i32) -> (i32, i32, i32) {
    %c0_i32 = arith.constant 0 : i32
    %c0_i32_0 = arith.constant 0 : i32
    return %arg0, %c0_i32, %arg1 : i32, i32, i32
  }
}

</mosaic_0001>

<bundles_post_ra>
// kernel: tpu_custom_call.1
= control target key start
LH: loop header
LB: loop body
LE: loop exit
PB: predicated region body
PF: predicated region fallthrough
CT: control target
= control target key end

     0   :  { %s3576_s0 = inlined_call_operand.vmem [shape: f32[2,32,256], index: 0, kind: input, shape index: {}]   ;;  %s3577_s1 = inlined_call_operand.vmem [shape: f32[32,32], index: 1, kind: input, shape index: {}]   ;;  %s3578_s2 = inlined_call_operand.hbm [shape: f32[32,32], index: 2, kind: input, shape index: {}]   ;;  %s3579_s3 = inlined_call_operand.vmem [shape: f32[32,1], index: 3, kind: input, shape index: {}]   ;;  %s3580_s4 = inlined_call_operand.vmem [shape: f32[32,1], index: 4, kind: input, shape index: {}]   ;;  %s3581_s5 = inlined_call_operand.vmem [shape: bf16[96,32], index: 5, kind: input, shape index: {}]   ;;  %s3582_s6 = inlined_call_operand.hbm [shape: bf16[32,32], index: 6, kind: input, shape index: {}]   ;;  %s3583_s7 = inlined_call_operand.vmem [shape: f32[32,1], index: 7, kind: input, shape index: {}]   ;;  %s3584_s8 = inlined_call_operand.hbm [shape: f32[2,32,256], index: 8, kind: output, shape index: {}]  }
   0x1   :  { %3617 = sst [smem:[#allocation39_spill]] %s3578_s2 }
   0x2   :  { %13 = vsyncpa [#allocation4], 0 }
   0x3   :  { %14 = vsyncpa [#allocation7], 0 }
   0x4   :  { %15 = vsyncpa [#allocation5], 0 }
   0x5   :  { %17 = vsyncpa [#allocation5 + $0x1], 0  ;;  %s2567_s27 = smov 0   ;;  %s2569_s28 = smov 0  }
   0x6   :  { %s2571_s29 = smov 0   ;;  %s2573_s30 = smov 0  }
   0x7   :  { %s2575_s9 = smov 0   ;;  %s2577_s10 = smov 0  }
   0x8 LB: > { %s1984_s11 = sadd.s32 4294967295, %s2511_s10   ;;  %s1985_s12 = sadd.s32 4294967294, %s2511_s10   ;;  %s2511_s10 = sphi %s2577_s10, %s23_s10   ;;  %s2507_s9 = sphi %s2575_s9, %s3701_s9   ;;  %s2503_s30 = sphi %s2573_s30, %s3700_s30   ;;  %s2499_s29 = sphi %s2571_s29, %s3699_s29   ;;  %s2495_s28 = sphi %s2569_s28, %s3698_s28   ;;  %s2491_s27 = sphi %s2567_s27, %s3697_s27  }
   0x9   : > { %s35_s13 = sadd.s32 1, %s2507_s9  ;;  %s217_s14 = sadd.s32 1, %s2499_s29 }
   0xa   : > { %p37_p0 = scmp.ge.s32.totalorder %s35_s13, 2  ;;  %p227_p1 = scmp.ne.s32.totalorder %s2499_s29, %s2495_s28 }
   0xb   : > { %p228_p2 = scmp.eq.s32.totalorder %s1984_s11, 1  ;;  %p233_p3 = scmp.ne.s32.totalorder %s2495_s28, %s2491_s27 }
   0xc   : > { %s3703_s13 = smov (%p37_p0, %s35_s13), 0  ;;  %p234_p5 = scmp.eq.s32.totalorder %s1985_s12, 1 }
   0xd   : > { %3618 = sst [smem:[#allocation12_spill]] %s3703_s13  ;;  %p2607_p4 = por %p228_p2, %p227_p1 }
   0xe   : > { %s212_s16 = ssub.s32 %s2507_s9, %s3703_s13  ;;  %p1986_p6 = scmp.ge.s32.totalorder %s2511_s10, 1 }
   0xf   : > { %p215_p7 = scmp.eq.s32.totalorder %s212_s16, 0  ;;  %p2614_p8 = por %p234_p5, %p233_p3 }
  0x10   : > { %p241_p9 = scmp.lt.s32.totalorder %s2511_s10, 3  ;;  %p2626_p11 = scmp.eq.s32.totalorder %s1984_s11, 0 }
  0x11   : > { %s2620_s18 = scalar_select %p215_p7, %s2499_s29, %s217_s14  }
  0x12   : > { %p2622_p10 = pnand %p1986_p6, %p241_p9  ;;  %s3623_s2 = sld [smem:[#allocation39_spill]] }
  0x13   : > { %s2513_s24 = smov [#allocation3]   ;;  %s278_s11 = sshll.u32 %s3582_s6, 4  ;;  %s279_s11 = int_to_ptr.hbm [resolvable:$true] %s278_s11 }
  0x14   : > { %p2141_p12 = pneg %p2622_p10  ;;  %s257_s25 = sshll.u32 %s2513_s24, 4  ;;  %s258_s25 = int_to_ptr.vmem [resolvable:$true] %s257_s25 }
  0x15   : > { %s2514_s14 = smov 128   ;;  %s2515_s16 = smov 8  }
  0x16   : > { %p2142_p13 = pnand %p2626_p11, %p2141_p12  ;;  %s2516_s13 = smov [#allocation6]  }
  0x17   : > { %s280_s21 = sshll.u32 %s2516_s13, 4  ;;  %s2517_s22 = smov 64   ;;  %s281_s21 = int_to_ptr.vmem [resolvable:$true] %s280_s21 }
  0x18   : > { %s255_s23 = sshll.u32 %s3623_s2, 4  ;;  %s2518_s2 = smov 4   ;;  %s256_s23 = int_to_ptr.hbm [resolvable:$true] %s255_s23 }
  0x19   : > { %2144 = dma.hbm_to_vmem [thread:$0]  (!%p2142_p13), %s256_s23, 512, %s258_s25, [#allocation4], %s2514_s14, %s2514_s14, %s2515_s16  }
  0x1a   : > { %2147 = dma.hbm_to_vmem [thread:$0]  (!%p2142_p13), %s279_s11, 256, %s281_s21, [#allocation7], %s2517_s22, %s2517_s22, %s2518_s2  }
  0x1b   : > { %307 = sbr.rel (%p2622_p10) target bundleno = 1840 (0x730), region = 52 }
  0x20   : > { %2478 = dma.done.wait (%p2626_p11), [#allocation4], 512  }
  0x21   : > { %2480 = vsyncadd (%p2626_p11), [#allocation4], 4294966784 }
  0x22   : > { %2482 = dma.done.wait (%p2626_p11), [#allocation7], 256  }
  0x23   : > { %2484 = vsyncadd (%p2626_p11), [#allocation7], 4294967040  ;;  %p347_p0 = scmp.lt.s32.totalorder %s2503_s30, 1  ;;  %v394_v30 = vld [vmem:[%s3577_s1] sm:$0xff]  ;;  %vm402_vm0 = vcmask 261120   ;;  %v395_v33 = vld [vmem:[%s3577_s1 + $0x8] sm:$0xff] }
  0x24   : > { %v396_v34 = vld [vmem:[%s3577_s1 + $0x10] sm:$0xff]  ;;  %v397_v35 = vld [vmem:[%s3577_s1 + $0x18] sm:$0xff]  ;;  %v398_v44 = vld [vmem:[#allocation3] sm:$0xff]  ;;  %v2519_v63 = vmov 0   ;;  %s344_s14 = sand.u32 1, %s2495_s28   ;;  %s2126_s22 = sshll.u32 %s2503_s30, 6 }
  0x25   : > { %s348_s13 = scalar_select %p347_p0, %s2503_s30, 1  ;;  %v399_v45 = vld [vmem:[#allocation3 + $0x8] sm:$0xff]  ;;  %v400_v46 = vld [vmem:[#allocation3 + $0x10] sm:$0xff]  ;;  %v401_v47 = vld [vmem:[#allocation3 + $0x18] sm:$0xff]  ;;  %2214 = vset.pattern.permute.xlu2 %v2519_v63  ;;  %2216 = vset.pattern.permute.xlu1 %v2519_v63 }
  0x26   : > { %2215 = vset.pattern.permute.xlu0 %v2519_v63  ;;  %s1993_s16 = sshll.u32 %s344_s14, 6  ;;  %s1885_s23 = scalar_lea.hbm %s3584_s8, %s2126_s22 }
  0x27   : > { %s2113_s2 = sshll.u32 %s348_s13, 6  ;;  %s3521_s21 = scalar_lea.vmem [#allocation8], %s1993_s16 }
  0x28   : > { %s2655_s24 = scalar_lea.vmem %s3576_s0, %s2113_s2  ;;  %s1886_s19 = sshll.u32 %s3521_s21, 4  ;;  %s1887_s19 = int_to_ptr.vmem [resolvable:$true] %s1886_s19 }
  0x29   : > { %v2658_v0 = vld [vmem:[%s2655_s24 + $0x30] sm:$0xff]  ;;  %v2661_v1 = vld [vmem:[%s2655_s24 + $0x38] sm:$0xff]  ;;  %v2680_v9 = vld [vmem:[%s2655_s24 + $0x20] sm:$0xff]  ;;  %s1888_s20 = sshll.u32 %s1885_s23, 4  ;;  %s1872_s30 = scalar_lea.sflag [#allocation5], %s344_s14  ;;  %s1889_s20 = int_to_ptr.hbm [resolvable:$true] %s1888_s20 }
  0x2a   : > { %v2664_v2 = vld [vmem:[%s2655_s24 + $0x10] sm:$0xff]  ;;  %v380_v3 = vmul.f32 %v2658_v0, %v2658_v0  ;;  %v381_v4 = vmul.f32 %v2661_v1, %v2661_v1  ;;  %v2671_v5 = vld [vmem:[%s2655_s24 + $0x18] sm:$0xff]  ;;  %v371_v7 = vadd.f32 %v2661_v1, %v2658_v0  ;;  %v2683_v10 = vld [vmem:[%s2655_s24 + $0x28] sm:$0xff]  ;;  %v378_v15 = vmul.f32 %v2680_v9, %v2680_v9  ;;  %s2439_s25 = sshra.s32 %s1889_s20, 4  ;;  %s2445_s16 = scalar_lea.hbm %s3584_s8, 128  ;;  %s2440_s25 = int_to_ptr.hbm [resolvable:$true] %s2439_s25 }
  0x2b   : > { %v376_v6 = vmul.f32 %v2664_v2, %v2664_v2  ;;  %v377_v8 = vmul.f32 %v2671_v5, %v2671_v5  ;;  %v2686_v12 = vld [vmem:[%s2655_s24] sm:$0xff]  ;;  %v2689_v13 = vld [vmem:[%s2655_s24 + $0x8] sm:$0xff]  ;;  %v379_v16 = vmul.f32 %v2683_v10, %v2683_v10  ;;  %v368_v19 = vadd.f32 %v2683_v10, %v2680_v9  ;;  %s2441_s26 = scalar_lea.hbm %s2440_s25, 64  ;;  %p2446_p5 = scmp.lt.s32.totalorder %s2440_s25, %s3584_s8 }
  0x2c   : > { %v391_v11 = vadd.f32 %v381_v4, %v380_v3  ;;  %372 = vadd.xlane.f32.xlu2 %v371_v7  ;;  %v374_v17 = vmul.f32 %v2686_v12, %v2686_v12  ;;  %v375_v18 = vmul.f32 %v2689_v13, %v2689_v13  ;;  %v365_v22 = vadd.f32 %v2671_v5, %v2664_v2  ;;  %p2442_p1 = scmp.ne.s32.totalorder %s2440_s25, %s2441_s26  ;;  %p2447_p6 = scmp.lt.s32.totalorder %s2445_s16, %s2441_s26 }
  0x2d   : > { %v385_v14 = vadd.f32 %v377_v8, %v376_v6  ;;  %v388_v20 = vadd.f32 %v379_v16, %v378_v15  ;;  %v362_v23 = vadd.f32 %v2689_v13, %v2686_v12 }
  0x2e   : > { %392 = vadd.xlane.f32.xlu0 %v391_v11  ;;  %v382_v21 = vadd.f32 %v375_v18, %v374_v17  ;;  %p2443_p2 = pnand %p2442_p1, %p2607_p4  ;;  %p2448_p7 = por %p2447_p6, %p2446_p5 }
  0x2f   : > { %386 = vadd.xlane.f32.xlu1 %v385_v14 }
  0x30   : > { %p2444_p3 = pneg %p2443_p2 }
  0x32   : > { %p2449_p9 = pnand %p2448_p7, %p2444_p3 }
  0x34   : > { %369 = vadd.xlane.f32.xlu2 %v368_v19 }
  0x36   : > { %389 = vadd.xlane.f32.xlu0 %v388_v20 }
  0x37   : > { %383 = vadd.xlane.f32.xlu1 %v382_v21 }
  0x3e   : > { %366 = vadd.xlane.f32.xlu0 %v365_v22 }
  0x3f   : > { %363 = vadd.xlane.f32.xlu1 %v362_v23 }
  0x9f   : > { %v373_v24 = vpop.xlane.xlu2 %372 }
  0xa0   : > { %427 = vmatpush.msra.mxu0 %v373_v24 }
  0xa1   : > { %v393_v25 = vpop.xlane.xlu0 %392 }
  0xa2   : > { %501 = vmatpush.msra.mxu2 %v393_v25  ;;  %v387_v26 = vpop.xlane.xlu1 %386 }
  0xa7   : > { %v370_v27 = vpop.xlane.xlu2 %369 }
  0xa8   : > { %428 = vmatpush.msra.mxu0 %v370_v27 }
  0xa9   : > { %v390_v28 = vpop.xlane.xlu0 %389 }
  0xaa   : > { %502 = vmatpush.msra.mxu2 %v390_v28  ;;  %v384_v29 = vpop.xlane.xlu1 %383 }
  0xac   : > { %503 = vmatpush.msra.mxu2 %v387_v26 }
  0xae   : > { %504 = vmatpush.msra.mxu2 %v384_v29 }
  0xaf   : > { %2004 = vmatmul.msk.f32.vlgmr.msra.gmra.mxu2 %vm402_vm0, %v394_v30 }
  0xb1   : > { %v367_v31 = vpop.xlane.xlu0 %366 }
  0xb2   : > { %429 = vmatpush.msra.mxu0 %v367_v31  ;;  %v364_v32 = vpop.xlane.xlu1 %363 }
  0xb4   : > { %430 = vmatpush.msra.mxu0 %v364_v32 }
  0xb5   : > { %1996 = vmatmul.msk.f32.vlgmr.msra.gmra.mxu0 %vm402_vm0, %v394_v30 }
  0xb7   : > { %2005 = vmatmul.msk.f32.gmra.mxu2 %vm402_vm0, %v395_v33 }
  0xbd   : > { %1997 = vmatmul.msk.f32.gmra.mxu0 %vm402_vm0, %v395_v33 }
  0xbf   : > { %2006 = vmatmul.msk.f32.gmra.mxu2 %vm402_vm0, %v396_v34 }
  0xc5   : > { %1998 = vmatmul.msk.f32.gmra.mxu0 %vm402_vm0, %v396_v34 }
  0xc7   : > { %2007 = vmatmul.msk.f32.gmra.mxu2 %vm402_vm0, %v397_v35 }
  0xcd   : > { %1999 = vmatmul.msk.f32.gmra.mxu0 %vm402_vm0, %v397_v35 }
 0x132   : > { %v432_v36 = vpop.f32.mrf.mxu0  ;;  %v506_v37 = vpop.f32.mrf.mxu2 }
 0x13a   : > { %v435_v38 = vpop.f32.mrf.mxu0  ;;  %v509_v39 = vpop.f32.mrf.mxu2 }
 0x142   : > { %v438_v40 = vpop.f32.mrf.mxu0  ;;  %v512_v41 = vpop.f32.mrf.mxu2 }
 0x14a   : > { %v441_v42 = vpop.f32.mrf.mxu0  ;;  %v515_v43 = vpop.f32.mrf.mxu2 }
 0x14b   : > { %468 = vmatpush.msra.mxu1 %v441_v42  ;;  %530 = vmatpush.msra.mxu3 %v515_v43  ;;  %v609_v42 = vld [vmem:[%s3579_s3 + $0x10] sm:$0xff] }
 0x14d   : > { %469 = vmatpush.msra.mxu1 %v438_v40  ;;  %531 = vmatpush.msra.mxu3 %v512_v41 }
 0x14f   : > { %470 = vmatpush.msra.mxu1 %v435_v38  ;;  %532 = vmatpush.msra.mxu3 %v509_v39 }
 0x151   : > { %471 = vmatpush.msra.mxu1 %v432_v36  ;;  %533 = vmatpush.msra.mxu3 %v506_v37 }
 0x152   : > { %2008 = vmatmul.msk.f32.vlgmr.msra.gmra.mxu3 %vm402_vm0, %v398_v44  ;;  %2000 = vmatmul.msk.f32.vlgmr.msra.gmra.mxu1 %vm402_vm0, %v398_v44 }
 0x15a   : > { %2009 = vmatmul.msk.f32.gmra.mxu3 %vm402_vm0, %v399_v45  ;;  %2001 = vmatmul.msk.f32.gmra.mxu1 %vm402_vm0, %v399_v45 }
 0x162   : > { %2010 = vmatmul.msk.f32.gmra.mxu3 %vm402_vm0, %v400_v46  ;;  %2002 = vmatmul.msk.f32.gmra.mxu1 %vm402_vm0, %v400_v46 }
 0x16a   : > { %2011 = vmatmul.msk.f32.gmra.mxu3 %vm402_vm0, %v401_v47  ;;  %2003 = vmatmul.msk.f32.gmra.mxu1 %vm402_vm0, %v401_v47  ;;  %v617_v47 = vld [vmem:[%s3580_s4 + $0x10] sm:$0xff] }
 0x1cf   : > { %v473_v48 = vpop.f32.mrf.mxu1 }
 0x1d0   : > { %v2733_v49 = vmul.f32 0.00390625, %v473_v48 }
 0x1d2   : > { %v551_v51 = vmul.f32 %v2733_v49, %v2733_v49 }
 0x1d5   : > { %v535_v50 = vpop.f32.mrf.mxu3 }
 0x1d6   : > { %v547_v52 = vmul.f32 0.00390625, %v535_v50 }
 0x1d7   : > { %v476_v53 = vpop.f32.mrf.mxu1 }
 0x1d8   : > { %v2737_v54 = vmul.f32 0.00390625, %v476_v53  ;;  %v555_v55 = vsub.f32 %v547_v52, %v551_v51 }
 0x1da   : > { %v552_v56 = vmul.f32 %v2737_v54, %v2737_v54  ;;  %v559_v59 = vmax.f32 %v555_v55, 0.0 }
 0x1dc   : > { %v563_v3 = vadd.f32 1e-05, %v559_v59 }
 0x1dd   : > { %v538_v57 = vpop.f32.mrf.mxu3 }
 0x1de   : > { %v548_v58 = vmul.f32 0.00390625, %v538_v57  ;;  %2217 = vrsqrt.f32 %v563_v3  ;;  %vm573_vm5 = vweird.f32 %v563_v3 }
 0x1df   : > { %v479_v60 = vpop.f32.mrf.mxu1 }
 0x1e0   : > { %v556_v61 = vsub.f32 %v548_v58, %v552_v56  ;;  %v487_v62 = vmul.f32 0.00390625, %v479_v60  ;;  %v607_v56 = vld [vmem:[%s3579_s3] sm:$0xff]  ;;  %v610_v58 = vld [vmem:[%s3579_s3 + $0x18] sm:$0xff] }
 0x1e2   : > { %v560_v4 = vmax.f32 %v556_v61, 0.0  ;;  %v553_v6 = vmul.f32 %v487_v62, %v487_v62 }
 0x1e4   : > { %v2741_v14 = vadd.f32 1e-05, %v560_v4  ;;  %v2218_v20 = vpop.eup %2217 }
 0x1e5   : > { %v541_v7 = vpop.f32.mrf.mxu3  ;;  %v568_v23 = vmul.f32 %v2218_v20, %v563_v3  ;;  %vm574_vm4 = vweird.f32 %v2218_v20  ;;  %v608_v3 = vld [vmem:[%s3579_s3 + $0x8] sm:$0xff] }
 0x1e6   : > { %v549_v8 = vmul.f32 0.00390625, %v541_v7  ;;  %2219 = vrsqrt.f32 %v2741_v14  ;;  %vm575_vm8 = vmor %vm573_vm5, %vm574_vm4  ;;  %vm583_vm11 = vweird.f32 %v2741_v14  ;;  %v618_v7 = vld [vmem:[%s3580_s4 + $0x18] sm:$0xff] }
 0x1e7   : > { %v482_v11 = vpop.f32.mrf.mxu1  ;;  %v569_v28 = vmul.f32 %v2218_v20, %v568_v23 }
 0x1e8   : > { %v557_v15 = vsub.f32 %v549_v8, %v553_v6  ;;  %v2743_v16 = vmul.f32 0.00390625, %v482_v11 }
 0x1e9   : > { %v570_v33 = vmul.f32 0.5, %v569_v28 }
 0x1ea   : > { %v561_v17 = vmax.f32 %v557_v15, 0.0  ;;  %v554_v19 = vmul.f32 %v2743_v16, %v2743_v16 }
 0x1eb   : > { %v571_v38 = vsub.f32 1.5, %v570_v33 }
 0x1ec   : > { %v565_v18 = vadd.f32 1e-05, %v561_v17  ;;  %v2220_v25 = vpop.eup %2219 }
 0x1ed   : > { %v544_v21 = vpop.f32.mrf.mxu3  ;;  %v578_v30 = vmul.f32 %v2220_v25, %v2741_v14  ;;  %v572_v48 = vmul.f32 %v2218_v20, %v571_v38  ;;  %vm584_vm9 = vweird.f32 %v2220_v25  ;;  %v616_v14 = vld [vmem:[%s3580_s4 + $0x8] sm:$0xff] }
 0x1ee   : > { %2221 = vrsqrt.f32 %v565_v18  ;;  %v550_v22 = vmul.f32 0.00390625, %v544_v21  ;;  %vm593_vm2 = vweird.f32 %v565_v18  ;;  %vm585_vm12 = vmor %vm583_vm11, %vm584_vm9 }
 0x1ef   : > { %v579_v34 = vmul.f32 %v2220_v25, %v578_v30  ;;  %v576_v55 = vsel %vm575_vm8, %v2218_v20, %v572_v48  ;;  %v1759_v20 = vld [vmem:[%s3583_s7 + $0x10] sm:$0xff] }
 0x1f0   : > { %v558_v24 = vsub.f32 %v550_v22, %v554_v19  ;;  %v611_v61 = vmul.f32 %v607_v56, %v576_v55  ;;  %v1758_v19 = vld [vmem:[%s3583_s7 + $0x8] sm:$0xff] }
 0x1f1   : > { %v580_v39 = vmul.f32 0.5, %v579_v34 }
 0x1f2   : > { %v562_v26 = vmax.f32 %v558_v24, 0.0  ;;  %v619_v17 = vmul.f32 %v611_v61, %v2733_v49  ;;  %v1760_v49 = vld [vmem:[%s3583_s7 + $0x18] sm:$0xff] }
 0x1f3   : > { %v581_v50 = vsub.f32 1.5, %v580_v39 }
 0x1f4   : > { %v2222_v27 = vpop.eup %2221  ;;  %v566_v29 = vadd.f32 1e-05, %v562_v26 }
 0x1f5   : > { %v588_v31 = vmul.f32 %v2222_v27, %v565_v18  ;;  %vm594_vm1 = vweird.f32 %v2222_v27  ;;  %v582_v59 = vmul.f32 %v2220_v25, %v581_v50 }
 0x1f6   : > { %2223 = vrsqrt.f32 %v566_v29  ;;  %vm595_vm3 = vmor %vm593_vm2, %vm594_vm1  ;;  %vm603_vm6 = vweird.f32 %v566_v29 }
 0x1f7   : > { %v589_v32 = vmul.f32 %v2222_v27, %v588_v31  ;;  %v586_v63 = vsel %vm585_vm12, %v2220_v25, %v582_v59  ;;  %v2118_v59 = vld [vmem:[%s3581_s5 + $0x20] sm:$0xff] }
 0x1f8   : > { %v612_v4 = vmul.f32 %v608_v3, %v586_v63 }
 0x1f9   : > { %v590_v35 = vmul.f32 0.5, %v589_v32 }
 0x1fa   : > { %v620_v11 = vmul.f32 %v612_v4, %v2737_v54  ;;  %v1757_v54 = vld [vmem:[%s3583_s7] sm:$0xff] }
 0x1fb   : > { %v591_v36 = vsub.f32 1.5, %v590_v35 }
 0x1fc   : > { %v2224_v37 = vpop.eup %2223  ;;  %v624_v15 = vsub.f32 %v616_v14, %v620_v11 }
 0x1fd   : > { %v598_v40 = vmul.f32 %v2224_v37, %v566_v29  ;;  %v592_v41 = vmul.f32 %v2222_v27, %v591_v36  ;;  %vm604_vm7 = vweird.f32 %v2224_v37 }
 0x1fe   : > { %vm605_vm10 = vmor %vm603_vm6, %vm604_vm7 }
 0x1ff   : > { %v599_v43 = vmul.f32 %v2224_v37, %v598_v40  ;;  %v596_v44 = vsel %vm595_vm3, %v2222_v27, %v592_v41 }
 0x200   : > { %v613_v45 = vmul.f32 %v609_v42, %v596_v44 }
 0x201   : > { %v600_v46 = vmul.f32 0.5, %v599_v43 }
 0x202   : > { %639 = vperm.xlu2 %2214, %v613_v45   ;;  %v621_v51 = vmul.f32 %v613_v45, %v487_v62  ;;  %v2116_v45 = vld [vmem:[%s3581_s5 + $0x10] sm:$0xff] }
 0x203   : > { %v601_v52 = vsub.f32 1.5, %v600_v46  ;;  %v2115_v46 = vld [vmem:[%s3581_s5 + $0x8] sm:$0xff] }
 0x204   : > { %v625_v53 = vsub.f32 %v617_v47, %v621_v51 }
 0x205   : > { %v602_v57 = vmul.f32 %v2224_v37, %v601_v52 }
 0x206   : > { %667 = vperm.xlu1 %2216, %v625_v53  }
 0x207   : > { %v606_v60 = vsel %vm605_vm10, %v2224_v37, %v602_v57 }
 0x208   : > { %v614_v62 = vmul.f32 %v610_v58, %v606_v60  ;;  %v2119_v60 = vld [vmem:[%s3581_s5 + $0x28] sm:$0xff] }
 0x20a   : > { %629 = vperm.xlu2 %2214, %v611_v61   ;;  %644 = vperm.xlu0 %2215, %v614_v62   ;;  %v622_v6 = vmul.f32 %v614_v62, %v2743_v16  ;;  %v615_v16 = vld [vmem:[%s3580_s4] sm:$0xff] }
 0x20b   : > { %v623_v18 = vsub.f32 %v615_v16, %v619_v17 }
 0x20c   : > { %v626_v8 = vsub.f32 %v618_v7, %v622_v6 }
 0x20e   : > { %634 = vperm.xlu1 %2216, %v612_v4  }
 0x212   : > { %672 = vperm.xlu2 %2214, %v626_v8  }
 0x216   : > { %662 = vperm.xlu1 %2216, %v624_v15  }
 0x21a   : > { %657 = vperm.xlu2 %2214, %v623_v18  }
 0x21e   : > { %1768 = vperm.xlu1 %2216, %v1758_v19  }
 0x222   : > { %1763 = vperm.xlu2 %2214, %v1757_v54  }
 0x226   : > { %1778 = vperm.xlu1 %2216, %v1760_v49  }
 0x22a   : > { %1773 = vperm.xlu2 %2214, %v1759_v20  }
 0x25c   : > { %v640_v21 = vpop.permute.xlu2 %639 }
 0x25d   : > { %v651_v26 = vmul.f32 %v640_v21, %v2680_v9  ;;  %v652_v27 = vmul.f32 %v640_v21, %v2683_v10 }
 0x264   : > { %v630_v22 = vpop.permute.xlu2 %629 }
 0x265   : > { %v647_v9 = vmul.f32 %v630_v22, %v2686_v12  ;;  %v648_v10 = vmul.f32 %v630_v22, %v2689_v13 }
 0x26c   : > { %v673_v24 = vpop.permute.xlu2 %672 }
 0x274   : > { %v658_v37 = vpop.permute.xlu2 %657 }
 0x275   : > { %v675_v39 = vadd.f32 %v658_v37, %v647_v9  ;;  %v676_v40 = vadd.f32 %v658_v37, %v648_v10 }
 0x278   : > { %v668_v23 = vpop.permute.xlu1 %667 }
 0x279   : > { %v679_v30 = vadd.f32 %v668_v23, %v651_v26  ;;  %v680_v31 = vadd.f32 %v668_v23, %v652_v27 }
 0x27c   : > { %v645_v25 = vpop.permute.xlu0 %644 }
 0x27d   : > { %v653_v28 = vmul.f32 %v645_v25, %v2658_v0  ;;  %v654_v29 = vmul.f32 %v645_v25, %v2661_v1 }
 0x27f   : > { %v681_v32 = vadd.f32 %v673_v24, %v653_v28  ;;  %v682_v33 = vadd.f32 %v673_v24, %v654_v29 }
 0x280   : > { %v635_v34 = vpop.permute.xlu1 %634 }
 0x281   : > { %v685_v35 = vpack.c.bf16 %v681_v32, %v679_v30  ;;  %v686_v36 = vpack.c.bf16 %v682_v33, %v680_v31  ;;  %v649_v0 = vmul.f32 %v635_v34, %v2664_v2  ;;  %v650_v1 = vmul.f32 %v635_v34, %v2671_v5  ;;  %v2117_v2 = vld [vmem:[%s3581_s5 + $0x18] sm:$0xff]  ;;  %v2114_v5 = vld [vmem:[%s3581_s5] sm:$0xff] }
 0x283   : > { %721 = vmatpush.bf16.msrb.mxu0 %v685_v35  ;;  %740 = vmatpush.bf16.msrb.mxu1 %v686_v36 }
 0x284   : > { %779 = vmatpush.bf16.msrb.mxu2 %v685_v35  ;;  %798 = vmatpush.bf16.msrb.mxu3 %v686_v36 }
 0x288   : > { %v663_v38 = vpop.permute.xlu1 %662 }
 0x289   : > { %v677_v41 = vadd.f32 %v663_v38, %v649_v0  ;;  %v678_v42 = vadd.f32 %v663_v38, %v650_v1 }
 0x28b   : > { %v683_v43 = vpack.c.bf16 %v677_v41, %v675_v39  ;;  %v684_v44 = vpack.c.bf16 %v678_v42, %v676_v40 }
 0x28d   : > { %722 = vmatpush.bf16.msrb.mxu0 %v683_v43  ;;  %741 = vmatpush.bf16.msrb.mxu1 %v684_v44 }
 0x28e   : > { %780 = vmatpush.bf16.msrb.mxu2 %v683_v43  ;;  %799 = vmatpush.bf16.msrb.mxu3 %v684_v44 }
 0x290   : > { %2020 = vmatmul.msk.bf16.vlgmr.msrb.gmra.mxu0 %vm402_vm0, %v2114_v5  ;;  %2022 = vmatmul.msk.bf16.vlgmr.msrb.gmra.mxu1 %vm402_vm0, %v2114_v5 }
 0x291   : > { %837 = vmatpush.bf16.msra.mxu0 %v685_v35  ;;  %856 = vmatpush.bf16.msra.mxu1 %v686_v36 }
 0x292   : > { %2032 = vmatmul.msk.bf16.vlgmr.msrb.gmra.mxu2 %vm402_vm0, %v2116_v45  ;;  %2034 = vmatmul.msk.bf16.vlgmr.msrb.gmra.mxu3 %vm402_vm0, %v2116_v45 }
 0x295   : > { %838 = vmatpush.bf16.msra.mxu0 %v683_v43  ;;  %857 = vmatpush.bf16.msra.mxu1 %v684_v44 }
 0x2a0   : > { %2021 = vmatmul.msk.bf16.gmra.mxu0 %vm402_vm0, %v2115_v46  ;;  %2023 = vmatmul.msk.bf16.gmra.mxu1 %vm402_vm0, %v2115_v46 }
 0x2a2   : > { %2033 = vmatmul.msk.bf16.gmra.mxu2 %vm402_vm0, %v2117_v2  ;;  %2035 = vmatmul.msk.bf16.gmra.mxu3 %vm402_vm0, %v2117_v2 }
 0x2b0   : > { %2044 = vmatmul.msk.bf16.vlgmr.msra.gmra.mxu0 %vm402_vm0, %v2118_v59  ;;  %2046 = vmatmul.msk.bf16.vlgmr.msra.gmra.mxu1 %vm402_vm0, %v2118_v59 }
 0x2c0   : > { %2045 = vmatmul.msk.bf16.gmra.mxu0 %vm402_vm0, %v2119_v60  ;;  %2047 = vmatmul.msk.bf16.gmra.mxu1 %vm402_vm0, %v2119_v60 }
 0x30d   : > { %v724_v61 = vpop.f32.mrf.mxu0  ;;  %v743_v62 = vpop.f32.mrf.mxu1 }
 0x315   : > { %v782_v12 = vpop.f32.mrf.mxu2  ;;  %v801_v13 = vpop.f32.mrf.mxu3 }
 0x316   : > { %v726_v63 = vpop.f32.mrf.mxu0  ;;  %v745_v3 = vpop.f32.mrf.mxu1 }
 0x317   : > { %v753_v15 = vpack.c.bf16 %v726_v63, %v724_v61  ;;  %v754_v17 = vpack.c.bf16 %v745_v3, %v743_v62 }
 0x31d   : > { %v784_v47 = vpop.f32.mrf.mxu2  ;;  %v803_v48 = vpop.f32.mrf.mxu3 }
 0x31e   : > { %v811_v50 = vpack.c.bf16 %v784_v47, %v782_v12  ;;  %v812_v51 = vpack.c.bf16 %v803_v48, %v801_v13  ;;  %v729_v4 = vpop.f32.mrf.mxu0  ;;  %v748_v6 = vpop.f32.mrf.mxu1 }
 0x320   : > { %873 = vxpose.binary.xlu0.c.b16.start [1/4] (short) %v812_v51, %v811_v50, 128 }
 0x325   : > { %v787_v52 = vpop.f32.mrf.mxu2  ;;  %v806_v53 = vpop.f32.mrf.mxu3 }
 0x326   : > { %v731_v7 = vpop.f32.mrf.mxu0  ;;  %v750_v8 = vpop.f32.mrf.mxu1 }
 0x327   : > { %v755_v11 = vpack.c.bf16 %v731_v7, %v729_v4  ;;  %v756_v14 = vpack.c.bf16 %v750_v8, %v748_v6 }
 0x329   : > { %951 = vmatpush.bf16.msrb.mxu0 %v755_v11  ;;  %1040 = vmatpush.bf16.msrb.mxu1 %v756_v14 }
 0x32a   : > { %2127 = vmatpush.bf16.msra.mxu2 %v755_v11  ;;  %2129 = vmatpush.bf16.msra.mxu3 %v756_v14 }
 0x32d   : > { %v789_v55 = vpop.f32.mrf.mxu2  ;;  %v808_v56 = vpop.f32.mrf.mxu3  ;;  %952 = vmatpush.bf16.msrb.mxu0 %v753_v15  ;;  %1041 = vmatpush.bf16.msrb.mxu1 %v754_v17 }
 0x32e   : > { %v813_v57 = vpack.c.bf16 %v789_v55, %v787_v52  ;;  %v814_v58 = vpack.c.bf16 %v808_v56, %v806_v53  ;;  %2128 = vmatpush.bf16.msra.mxu2 %v753_v15  ;;  %2130 = vmatpush.bf16.msra.mxu3 %v754_v17  ;;  %v840_v23 = vpop.f32.mrf.mxu0  ;;  %v859_v24 = vpop.f32.mrf.mxu1 }
 0x330   : > { %874 = vxpose.binary.xlu0.c.b16.end [2/4] (short) %v814_v58, %v813_v57, 128 }
 0x336   : > { %v842_v26 = vpop.f32.mrf.mxu0  ;;  %v861_v27 = vpop.f32.mrf.mxu1 }
 0x337   : > { %v2837_v28 = vpack.c.bf16 %v842_v26, %v840_v23  ;;  %v2839_v29 = vpack.c.bf16 %v861_v27, %v859_v24 }
 0x339   : > { %3624 = vst [vmem:[#allocation13_spill] sm:$0xff] %v2837_v28 }
 0x33a   : > { %3625 = vst [vmem:[#allocation14_spill] sm:$0xff] %v2839_v29 }
 0x33e   : > { %v845_v31 = vpop.f32.mrf.mxu0  ;;  %v864_v32 = vpop.f32.mrf.mxu1 }
 0x346   : > { %v847_v34 = vpop.f32.mrf.mxu0  ;;  %v866_v35 = vpop.f32.mrf.mxu1 }
 0x347   : > { %v2843_v36 = vpack.c.bf16 %v847_v34, %v845_v31  ;;  %v2845_v37 = vpack.c.bf16 %v866_v35, %v864_v32 }
 0x349   : > { %3626 = vst [vmem:[#allocation15_spill] sm:$0xff] %v2843_v36 }
 0x34a   : > { %3627 = vst [vmem:[#allocation16_spill] sm:$0xff] %v2845_v37 }
 0x3cc   : > { %v881_v16 = vpop.trf.xlu0 }
 0x3cd   : > { %2048 = vmatmul.msk.bf16.vlgmr.msrb.gmra.mxu0 %vm402_vm0, %v881_v16  ;;  %2064 = vmatmul.msk.bf16.vlgmr.msrb.gmra.mxu1 %vm402_vm0, %v881_v16 }
 0x3d4   : > { %v882_v18 = vpop.trf.xlu0 }
 0x3dc   : > { %v883_v19 = vpop.trf.xlu0 }
 0x3dd   : > { %2049 = vmatmul.msk.bf16.gmra.mxu0 %vm402_vm0, %v883_v19  ;;  %2065 = vmatmul.msk.bf16.gmra.mxu1 %vm402_vm0, %v883_v19 }
 0x3e4   : > { %v884_v54 = vpop.trf.xlu0 }
 0x3ec   : > { %v885_v49 = vpop.trf.xlu0 }
 0x3ed   : > { %2050 = vmatmul.msk.bf16.gmra.mxu0 %vm402_vm0, %v885_v49  ;;  %2066 = vmatmul.msk.bf16.gmra.mxu1 %vm402_vm0, %v885_v49 }
 0x3f4   : > { %v886_v20 = vpop.trf.xlu0 }
 0x3fc   : > { %v887_v21 = vpop.trf.xlu0 }
 0x3fd   : > { %2051 = vmatmul.msk.bf16.gmra.mxu0 %vm402_vm0, %v887_v21  ;;  %2067 = vmatmul.msk.bf16.gmra.mxu1 %vm402_vm0, %v887_v21 }
 0x404   : > { %v888_v22 = vpop.trf.xlu0 }
 0x40c   : > { %v889_v25 = vpop.trf.xlu0 }
 0x40d   : > { %2052 = vmatmul.msk.bf16.vlgmr.msra.gmra.mxu2 %vm402_vm0, %v889_v25  ;;  %2068 = vmatmul.msk.bf16.vlgmr.msra.gmra.mxu3 %vm402_vm0, %v889_v25 }
 0x414   : > { %v890_v30 = vpop.trf.xlu0 }
 0x41c   : > { %v891_v33 = vpop.trf.xlu0 }
 0x41d   : > { %2053 = vmatmul.msk.bf16.gmra.mxu2 %vm402_vm0, %v891_v33  ;;  %2069 = vmatmul.msk.bf16.gmra.mxu3 %vm402_vm0, %v891_v33 }
 0x424   : > { %v892_v9 = vpop.trf.xlu0 }
 0x42c   : > { %v893_v10 = vpop.trf.xlu0 }
 0x42d   : > { %2054 = vmatmul.msk.bf16.gmra.mxu2 %vm402_vm0, %v893_v10  ;;  %2070 = vmatmul.msk.bf16.gmra.mxu3 %vm402_vm0, %v893_v10 }
 0x434   : > { %v894_v0 = vpop.trf.xlu0 }
 0x43c   : > { %v895_v1 = vpop.trf.xlu0 }
 0x43d   : > { %2055 = vmatmul.msk.bf16.gmra.mxu2 %vm402_vm0, %v895_v1  ;;  %2071 = vmatmul.msk.bf16.gmra.mxu3 %vm402_vm0, %v895_v1 }
 0x444   : > { %v896_v46 = vpop.trf.xlu0 }
 0x44a   : > { %v2915_v61 = vpop.f32.mrf.mxu0  ;;  %v2929_v8 = vpop.f32.mrf.mxu1 }
 0x44d   : > { %2056 = vmatmul.msk.bf16.gmra.mxu2 %vm402_vm0, %v882_v18  ;;  %2072 = vmatmul.msk.bf16.gmra.mxu3 %vm402_vm0, %v882_v18 }
 0x452   : > { %v2921_v3 = vpop.f32.mrf.mxu0  ;;  %v2939_v16 = vpop.f32.mrf.mxu1 }
 0x453   : > { %3639 = vst [vmem:[#allocation28_spill] sm:$0xff] %v2939_v16 }
 0x45a   : > { %v2927_v7 = vpop.f32.mrf.mxu0  ;;  %v2947_v49 = vpop.f32.mrf.mxu1 }
 0x45b   : > { %3641 = vst [vmem:[#allocation30_spill] sm:$0xff] %v2947_v49  ;;  %v1123_v35 = vmax.f32 %v2915_v61, %v2927_v7 }
 0x45d   : > { %2057 = vmatmul.msk.bf16.gmra.mxu2 %vm402_vm0, %v884_v54  ;;  %2073 = vmatmul.msk.bf16.gmra.mxu3 %vm402_vm0, %v884_v54 }
 0x462   : > { %v2935_v15 = vpop.f32.mrf.mxu0  ;;  %v2955_v23 = vpop.f32.mrf.mxu1 }
 0x463   : > { %3638 = vst [vmem:[#allocation27_spill] sm:$0xff] %v2935_v15  ;;  %v1124_v32 = vmax.f32 %v2921_v3, %v2935_v15 }
 0x464   : > { %3644 = vst [vmem:[#allocation33_spill] sm:$0xff] %v2955_v23 }
 0x46a   : > { %v2945_v54 = vpop.f32.mrf.mxu0  ;;  %v2963_v27 = vpop.f32.mrf.mxu1 }
 0x46d   : > { %2058 = vmatmul.msk.bf16.gmra.mxu2 %vm402_vm0, %v886_v20  ;;  %2074 = vmatmul.msk.bf16.gmra.mxu3 %vm402_vm0, %v886_v20 }
 0x472   : > { %v2978_v10 = vpop.f32.mrf.mxu1 }
 0x473   : > { %3646 = vst [vmem:[#allocation35_spill] sm:$0xff] %v2978_v10 }
 0x47d   : > { %2059 = vmatmul.msk.bf16.gmra.mxu2 %vm402_vm0, %v888_v22  ;;  %2075 = vmatmul.msk.bf16.gmra.mxu3 %vm402_vm0, %v888_v22  ;;  %v2953_v22 = vpop.f32.mrf.mxu0 }
 0x47e   : > { %3643 = vst [vmem:[#allocation32_spill] sm:$0xff] %v2953_v22 }
 0x485   : > { %v2961_v26 = vpop.f32.mrf.mxu0 }
 0x48d   : > { %2060 = vmatmul.msk.bf16.gmra.mxu2 %vm402_vm0, %v890_v30  ;;  %2076 = vmatmul.msk.bf16.gmra.mxu3 %vm402_vm0, %v890_v30  ;;  %v2971_v33 = vpop.f32.mrf.mxu0 }
 0x48e   : > { %3645 = vst [vmem:[#allocation34_spill] sm:$0xff] %v2971_v33 }
 0x490   : > { %v2861_v38 = vpop.f32.mrf.mxu2  ;;  %v2863_v39 = vpop.f32.mrf.mxu3 }
 0x498   : > { %v2865_v40 = vpop.f32.mrf.mxu2  ;;  %v2867_v41 = vpop.f32.mrf.mxu3 }
 0x499   : > { %3628 = vst [vmem:[#allocation17_spill] sm:$0xff] %v2865_v40 }
 0x49a   : > { %3629 = vst [vmem:[#allocation18_spill] sm:$0xff] %v2867_v41 }
 0x49d   : > { %2061 = vmatmul.msk.bf16.gmra.mxu2 %vm402_vm0, %v892_v9  ;;  %2077 = vmatmul.msk.bf16.gmra.mxu3 %vm402_vm0, %v892_v9  ;;  %v1126_v9 = vmax.f32 %v1124_v32, %v2953_v22 }
 0x49f   : > { %v1128_v1 = vmax.f32 %v1126_v9, %v2971_v33  ;;  %v2994_v33 = vpop.f32.mrf.mxu1 }
 0x4a0   : > { %v2871_v42 = vpop.f32.mrf.mxu2  ;;  %v2873_v43 = vpop.f32.mrf.mxu3 }
 0x4a1   : > { %v1130_v37 = vmax.f32 %v1128_v1, %v2865_v40 }
 0x4a8   : > { %v2875_v44 = vpop.f32.mrf.mxu2  ;;  %v2877_v45 = vpop.f32.mrf.mxu3 }
 0x4a9   : > { %3630 = vst [vmem:[#allocation19_spill] sm:$0xff] %v2875_v44  ;;  %v1132_v28 = vmax.f32 %v1130_v37, %v2875_v44 }
 0x4ad   : > { %2062 = vmatmul.msk.bf16.gmra.mxu2 %vm402_vm0, %v894_v0  ;;  %2078 = vmatmul.msk.bf16.gmra.mxu3 %vm402_vm0, %v894_v0  ;;  %v1125_v0 = vmax.f32 %v1123_v35, %v2945_v54 }
 0x4b0   : > { %v2881_v2 = vpop.f32.mrf.mxu2  ;;  %v2883_v5 = vpop.f32.mrf.mxu3 }
 0x4b1   : > { %3631 = vst [vmem:[#allocation20_spill] sm:$0xff] %v2881_v2 }
 0x4b8   : > { %v2885_v12 = vpop.f32.mrf.mxu2  ;;  %v2887_v13 = vpop.f32.mrf.mxu3 }
 0x4b9   : > { %3632 = vst [vmem:[#allocation21_spill] sm:$0xff] %v2885_v12  ;;  %v1134_v22 = vmax.f32 %v1132_v28, %v2885_v12 }
 0x4bd   : > { %2063 = vmatmul.msk.bf16.gmra.mxu2 %vm402_vm0, %v896_v46  ;;  %2079 = vmatmul.msk.bf16.gmra.mxu3 %vm402_vm0, %v896_v46  ;;  %v1127_v46 = vmax.f32 %v1125_v0, %v2961_v26 }
 0x4bf   : > { %v1129_v36 = vmax.f32 %v1127_v46, %v2861_v38 }
 0x4c0   : > { %v2891_v47 = vpop.f32.mrf.mxu2  ;;  %v2893_v48 = vpop.f32.mrf.mxu3 }
 0x4c1   : > { %3633 = vst [vmem:[#allocation22_spill] sm:$0xff] %v2891_v47  ;;  %v1131_v32 = vmax.f32 %v1129_v36, %v2871_v42 }
 0x4c3   : > { %v1133_v35 = vmax.f32 %v1131_v32, %v2881_v2 }
 0x4c5   : > { %v1135_v0 = vmax.f32 %v1133_v35, %v2891_v47  ;;  %v1161_v35 = vmax.f32 %v2939_v16, %v2955_v23 }
 0x4c8   : > { %v2895_v50 = vpop.f32.mrf.mxu2  ;;  %v2897_v51 = vpop.f32.mrf.mxu3 }
 0x4c9   : > { %v1136_v9 = vmax.f32 %v1134_v22, %v2895_v50 }
 0x4d0   : > { %v2899_v52 = vpop.f32.mrf.mxu2  ;;  %v2901_v53 = vpop.f32.mrf.mxu3 }
 0x4d1   : > { %3634 = vst [vmem:[#allocation23_spill] sm:$0xff] %v2899_v52  ;;  %v1137_v46 = vmax.f32 %v1135_v0, %v2899_v52 }
 0x4d8   : > { %v2903_v55 = vpop.f32.mrf.mxu2  ;;  %v2905_v56 = vpop.f32.mrf.mxu3 }
 0x4d9   : > { %3635 = vst [vmem:[#allocation24_spill] sm:$0xff] %v2905_v56  ;;  %v1138_v1 = vmax.f32 %v1136_v9, %v2903_v55 }
 0x4e0   : > { %v2907_v57 = vpop.f32.mrf.mxu2  ;;  %v2909_v58 = vpop.f32.mrf.mxu3 }
 0x4e1   : > { %v1139_v28 = vmax.f32 %v1137_v46, %v2907_v57  ;;  %v1163_v46 = vmax.f32 %v1161_v35, %v2978_v10 }
 0x4e8   : > { %v2911_v59 = vpop.f32.mrf.mxu2  ;;  %v2913_v60 = vpop.f32.mrf.mxu3 }
 0x4e9   : > { %3636 = vst [vmem:[#allocation25_spill] sm:$0xff] %v2911_v59  ;;  %v1140_v37 = vmax.f32 %v1138_v1, %v2911_v59  ;;  %v3012_v1 = vpop.f32.mrf.mxu1  ;;  %v1160_v59 = vmax.f32 %v2929_v8, %v2947_v49 }
 0x4ea   : > { %3647 = vst [vmem:[#allocation36_spill] sm:$0xff] %v3012_v1  ;;  %v1165_v23 = vmax.f32 %v1163_v46, %v3012_v1 }
 0x4ec   : > { %v1167_v49 = vmax.f32 %v1165_v23, %v2867_v41 }
 0x4ee   : > { %v1169_v10 = vmax.f32 %v1167_v49, %v2877_v45 }
 0x4f0   : > { %v2917_v62 = vpop.f32.mrf.mxu2  ;;  %v2919_v63 = vpop.f32.mrf.mxu3 }
 0x4f1   : > { %v1141_v22 = vmax.f32 %v1139_v28, %v2917_v62 }
 0x4f8   : > { %v2923_v4 = vpop.f32.mrf.mxu2  ;;  %v2925_v6 = vpop.f32.mrf.mxu3 }
 0x4f9   : > { %3637 = vst [vmem:[#allocation26_spill] sm:$0xff] %v2923_v4  ;;  %v1142_v36 = vmax.f32 %v1140_v37, %v2923_v4 }
 0x500   : > { %v2931_v11 = vpop.f32.mrf.mxu2  ;;  %v2933_v14 = vpop.f32.mrf.mxu3 }
 0x501   : > { %v1143_v9 = vmax.f32 %v1141_v22, %v2931_v11 }
 0x508   : > { %v2937_v17 = vpop.f32.mrf.mxu2  ;;  %v2941_v18 = vpop.f32.mrf.mxu3 }
 0x509   : > { %3640 = vst [vmem:[#allocation29_spill] sm:$0xff] %v2941_v18  ;;  %v1144_v32 = vmax.f32 %v1142_v36, %v2937_v17  ;;  %v1162_v36 = vmax.f32 %v1160_v59, %v2963_v27 }
 0x510   : > { %v2943_v19 = vpop.f32.mrf.mxu2  ;;  %v2949_v20 = vpop.f32.mrf.mxu3 }
 0x511   : > { %v1145_v37 = vmax.f32 %v1143_v9, %v2943_v19 }
 0x518   : > { %v2951_v21 = vpop.f32.mrf.mxu2  ;;  %v2959_v25 = vpop.f32.mrf.mxu3 }
 0x519   : > { %3642 = vst [vmem:[#allocation31_spill] sm:$0xff] %v2951_v21  ;;  %v1146_v0 = vmax.f32 %v1144_v32, %v2951_v21  ;;  %v1164_v21 = vmax.f32 %v1162_v36, %v2994_v33 }
 0x520   : > { %v2957_v24 = vpop.f32.mrf.mxu2  ;;  %v2967_v31 = vpop.f32.mrf.mxu3 }
 0x521   : > { %v1147_v22 = vmax.f32 %v1145_v37, %v2957_v24  ;;  %v1171_v37 = vmax.f32 %v1169_v10, %v2887_v13 }
 0x523   : > { %v1173_v36 = vmax.f32 %v1171_v37, %v2897_v51 }
 0x528   : > { %v2965_v30 = vpop.f32.mrf.mxu2  ;;  %v2984_v29 = vpop.f32.mrf.mxu3 }
 0x529   : > { %v1148_v28 = vmax.f32 %v1146_v0, %v2965_v30  ;;  %v1166_v0 = vmax.f32 %v1164_v21, %v2863_v39 }
 0x52b   : > { %v1168_v46 = vmax.f32 %v1166_v0, %v2873_v43 }
 0x52d   : > { %v1170_v1 = vmax.f32 %v1168_v46, %v2883_v5 }
 0x52f   : > { %v1172_v23 = vmax.f32 %v1170_v1, %v2893_v48 }
 0x530   : > { %v2973_v34 = vpop.f32.mrf.mxu2  ;;  %v3000_v44 = vpop.f32.mrf.mxu3 }
 0x531   : > { %v1149_v35 = vmax.f32 %v1147_v22, %v2973_v34  ;;  %v1175_v22 = vmax.f32 %v1173_v36, %v2905_v56  ;;  %v1174_v21 = vmax.f32 %v1172_v23, %v2901_v53 }
 0x533   : > { %v1177_v49 = vmax.f32 %v1175_v22, %v2913_v60 }
 0x535   : > { %v1179_v0 = vmax.f32 %v1177_v49, %v2925_v6 }
 0x538   : > { %v2988_v15 = vpop.f32.mrf.mxu2  ;;  %v3023_v16 = vpop.f32.mrf.mxu3 }
 0x539   : > { %v1150_v32 = vmax.f32 %v1148_v28, %v2988_v15 }
 0x540   : > { %v3002_v40 = vpop.f32.mrf.mxu2  ;;  %v1118_v41 = vpop.f32.mrf.mxu3 }
 0x541   : > { %v1151_v59 = vmax.f32 %v1149_v35, %v3002_v40  ;;  %v1176_v35 = vmax.f32 %v1174_v21, %v2909_v58 }
 0x548   : > { %v1031_v4 = vpop.f32.mrf.mxu2  ;;  %v1120_v56 = vpop.f32.mrf.mxu3 }
 0x549   : > { %v1152_v9 = vmax.f32 %v1150_v32, %v1031_v4 }
 0x54b   : > { %v1153_v28 = vmax.f32 %v1151_v59, %v1152_v9  ;;  %v1178_v9 = vmax.f32 %v1176_v35, %v2919_v63  ;;  %v1181_v59 = vmax.f32 %v1179_v0, %v2941_v18 }
 0x54d   : > { %v1154_v32 = vrot.slane %v1153_v28, 4  ;;  %v1180_v46 = vmax.f32 %v1178_v9, %v2933_v14  ;;  %v1183_v1 = vmax.f32 %v1181_v59, %v2959_v25 }
 0x54f   : > { %v1155_v10 = vmax.f32 %v1153_v28, %v1154_v32  ;;  %v1182_v36 = vmax.f32 %v1180_v46, %v2949_v20  ;;  %v1185_v23 = vmax.f32 %v1183_v1, %v2984_v29 }
 0x551   : > { %v1156_v37 = vrot.slane %v1155_v10, 2  ;;  %v1184_v22 = vmax.f32 %v1182_v36, %v2967_v31  ;;  %v1187_v21 = vmax.f32 %v1185_v23, %v3023_v16 }
 0x553   : > { %v1157_v49 = vmax.f32 %v1155_v10, %v1156_v37  ;;  %v1186_v28 = vmax.f32 %v1184_v22, %v3000_v44  ;;  %v1189_v32 = vmax.f32 %v1187_v21, %v1120_v56 }
 0x555   : > { %v1188_v35 = vmax.f32 %v1186_v28, %v1118_v41  ;;  %v1158_v0 = vrot.slane %v1157_v49, 1 }
 0x557   : > { %v1190_v18 = vmax.f32 %v1188_v35, %v1189_v32  ;;  %v3050_v9 = vmax.f32 %v1157_v49, %v1158_v0 }
 0x559   : > { %v1191_v59 = vrot.slane %v1190_v18, 4  ;;  %v1249_v46 = vsub.f32 %v2957_v24, %v3050_v9  ;;  %v1251_v1 = vsub.f32 %v2965_v30, %v3050_v9  ;;  %v1253_v36 = vsub.f32 %v2973_v34, %v3050_v9 }
 0x55a   : > { %v1255_v10 = vsub.f32 %v2988_v15, %v3050_v9  ;;  %v1257_v28 = vsub.f32 %v3002_v40, %v3050_v9  ;;  %v1259_v24 = vsub.f32 %v1031_v4, %v3050_v9  ;;  %v3650_v4 = vld [vmem:[#allocation27_spill] sm:$0xff] }
 0x55b   : > { %v1192_v37 = vmax.f32 %v1190_v18, %v1191_v59  ;;  %v3060_v23 = vpack.c.bf16 %v1251_v1, %v1249_v46  ;;  %v1197_v59 = vsub.f32 %v2915_v61, %v3050_v9  ;;  %v1199_v46 = vsub.f32 %v2921_v3, %v3050_v9  ;;  %v3652_v61 = vld [vmem:[#allocation34_spill] sm:$0xff] }
 0x55c   : > { %v3062_v22 = vpack.c.bf16 %v1255_v10, %v1253_v36  ;;  %v1291_v30 = vpack.c.bf16 %v1259_v24, %v1257_v28  ;;  %v3651_v10 = vld [vmem:[#allocation32_spill] sm:$0xff]  ;;  %v1227_v28 = vsub.f32 %v2895_v50, %v3050_v9  ;;  %v3656_v3 = vld [vmem:[#allocation26_spill] sm:$0xff]  ;;  %v1241_v50 = vsub.f32 %v2931_v11, %v3050_v9 }
 0x55d   : > { %3648 = vst [vmem:[#allocation37_spill] sm:$0xff] %v3060_v23  ;;  %v1193_v21 = vrot.slane %v1192_v37, 2  ;;  %v1243_v24 = vsub.f32 %v2937_v17, %v3050_v9  ;;  %v3659_v11 = vld [vmem:[#allocation30_spill] sm:$0xff]  ;;  %v3660_v17 = vld [vmem:[#allocation33_spill] sm:$0xff]  ;;  %v3661_v23 = vld [vmem:[#allocation35_spill] sm:$0xff] }
 0x55e   : > { %3649 = vst [vmem:[#allocation38_spill] sm:$0xff] %v3062_v22  ;;  %v1353_v34 = vunpack.c.l.bf16 %v1291_v30  ;;  %v1355_v0 = vunpack.c.h.bf16 %v1291_v30  ;;  %v3654_v30 = vld [vmem:[#allocation19_spill] sm:$0xff] }
 0x55f   : > { %v1194_v49 = vmax.f32 %v1192_v37, %v1193_v21 }
 0x560   : > { %v1477_v21 = vmul.f32 1.442695, %v1353_v34  ;;  %v1237_v34 = vsub.f32 %v2917_v62, %v3050_v9 }
 0x561   : > { %v1195_v32 = vrot.slane %v1194_v49, 1 }
 0x562   : > { %2225 = vpow2.f32 %v1477_v21  ;;  %v3658_v21 = vld [vmem:[#allocation28_spill] sm:$0xff] }
 0x563   : > { %v3067_v35 = vmax.f32 %v1194_v49, %v1195_v32  ;;  %v3653_v49 = vld [vmem:[#allocation17_spill] sm:$0xff]  ;;  %v1481_v32 = vmul.f32 1.442695, %v1355_v0  ;;  %v1231_v0 = vsub.f32 %v2903_v55, %v3050_v9  ;;  %v1245_v55 = vsub.f32 %v2943_v19, %v3050_v9 }
 0x565   : > { %v1258_v15 = vsub.f32 %v1118_v41, %v3067_v35  ;;  %v1260_v18 = vsub.f32 %v1120_v56, %v3067_v35  ;;  %v1233_v41 = vsub.f32 %v2907_v57, %v3050_v9  ;;  %v1239_v56 = vsub.f32 %v3656_v3, %v3050_v9  ;;  %v3657_v57 = vld [vmem:[#allocation31_spill] sm:$0xff] }
 0x566   : > { %2227 = vpow2.f32 %v1481_v32  ;;  %v1198_v62 = vsub.f32 %v2929_v8, %v3067_v35  ;;  %v1200_v3 = vsub.f32 %v3658_v21, %v3067_v35  ;;  %v1202_v40 = vsub.f32 %v3659_v11, %v3067_v35  ;;  %v3662_v8 = vld [vmem:[#allocation36_spill] sm:$0xff]  ;;  %v3663_v11 = vld [vmem:[#allocation18_spill] sm:$0xff] }
 0x567   : > { %v1292_v36 = vpack.c.bf16 %v1260_v18, %v1258_v15  ;;  %v3655_v15 = vld [vmem:[#allocation25_spill] sm:$0xff]  ;;  %v1204_v32 = vsub.f32 %v3660_v17, %v3067_v35  ;;  %v1206_v19 = vsub.f32 %v2963_v27, %v3067_v35  ;;  %v1212_v22 = vsub.f32 %v3662_v8, %v3067_v35 }
 0x568   : > { %v1235_v18 = vsub.f32 %v3655_v15, %v3050_v9  ;;  %v1247_v15 = vsub.f32 %v3657_v57, %v3050_v9  ;;  %v1208_v57 = vsub.f32 %v3661_v23, %v3067_v35  ;;  %v1214_v21 = vsub.f32 %v2863_v39, %v3067_v35  ;;  %v3151_v8 = vpop.eup %2225 }
 0x569   : > { %v1354_v37 = vunpack.c.l.bf16 %v1292_v36  ;;  %v1356_v1 = vunpack.c.h.bf16 %v1292_v36  ;;  %v1210_v36 = vsub.f32 %v2994_v33, %v3067_v35  ;;  %v1216_v52 = vsub.f32 %v3663_v11, %v3067_v35  ;;  %3664 = vst [vmem:[#allocation27_spill] sm:$0xff] %v3151_v8 }
 0x56a   : > { %v1218_v17 = vsub.f32 %v2873_v43, %v3067_v35  ;;  %v1220_v27 = vsub.f32 %v2877_v45, %v3067_v35  ;;  %v1222_v23 = vsub.f32 %v2883_v5, %v3067_v35  ;;  %v1224_v33 = vsub.f32 %v2887_v13, %v3067_v35  ;;  %v3666_v45 = vld [vmem:[#allocation24_spill] sm:$0xff] }
 0x56b   : > { %v1479_v47 = vmul.f32 1.442695, %v1354_v37  ;;  %v1483_v12 = vmul.f32 1.442695, %v1356_v1  ;;  %v1226_v39 = vsub.f32 %v2893_v48, %v3067_v35  ;;  %v1228_v11 = vsub.f32 %v2897_v51, %v3067_v35 }
 0x56c   : > { %v1230_v43 = vsub.f32 %v2901_v53, %v3067_v35  ;;  %v3159_v37 = vpop.eup %2227  ;;  %v1232_v5 = vsub.f32 %v3666_v45, %v3067_v35  ;;  %v1234_v13 = vsub.f32 %v2909_v58, %v3067_v35  ;;  %v1236_v1 = vsub.f32 %v2913_v60, %v3067_v35  ;;  %v3667_v45 = vld [vmem:[#allocation29_spill] sm:$0xff] }
 0x56d   : > { %3665 = vst [vmem:[#allocation32_spill] sm:$0xff] %v3159_v37  ;;  %v1261_v8 = vpack.c.bf16 %v1199_v46, %v1197_v59  ;;  %v1238_v48 = vsub.f32 %v2919_v63, %v3067_v35  ;;  %v1240_v51 = vsub.f32 %v2925_v6, %v3067_v35  ;;  %v1242_v53 = vsub.f32 %v2933_v14, %v3067_v35 }
 0x56e   : > { %v1262_v37 = vpack.c.bf16 %v1200_v3, %v1198_v62  ;;  %2229 = vpow2.f32 %v1479_v47  ;;  %v1244_v2 = vsub.f32 %v3667_v45, %v3067_v35  ;;  %v1246_v58 = vsub.f32 %v2949_v20, %v3067_v35 }
 0x56f   : > { %v1248_v60 = vsub.f32 %v2959_v25, %v3067_v35  ;;  %2231 = vpow2.f32 %v1483_v12  ;;  %v1250_v63 = vsub.f32 %v2967_v31, %v3067_v35  ;;  %v1252_v6 = vsub.f32 %v2984_v29, %v3067_v35 }
 0x570   : > { %v3668_v59 = vsub.f32 %v2927_v7, %v3050_v9  ;;  %v3669_v20 = vsub.f32 %v3650_v4, %v3050_v9  ;;  %v3670_v12 = vsub.f32 %v2945_v54, %v3050_v9  ;;  %v3671_v31 = vsub.f32 %v3651_v10, %v3050_v9 }
 0x571   : > { %v1293_v46 = vunpack.c.l.bf16 %v1261_v8  ;;  %v3672_v62 = vsub.f32 %v2961_v26, %v3050_v9  ;;  %v3673_v3 = vsub.f32 %v3652_v61, %v3050_v9  ;;  %v3674_v4 = vsub.f32 %v2861_v38, %v3050_v9  ;;  %v3680_v38 = vld [vmem:[#allocation21_spill] sm:$0xff] }
 0x572   : > { %v1263_v25 = vpack.c.bf16 %v3669_v20, %v3668_v59  ;;  %v3199_v29 = vpack.c.bf16 %v3671_v31, %v3670_v12  ;;  %v3675_v54 = vsub.f32 %v3653_v49, %v3050_v9  ;;  %v3217_v10 = vpack.c.bf16 %v1204_v32, %v1202_v40  ;;  %v3678_v12 = vld [vmem:[#allocation20_spill] sm:$0xff] }
 0x573   : > { %v3207_v7 = vpack.c.bf16 %v3673_v3, %v3672_v62  ;;  %v1294_v59 = vunpack.c.l.bf16 %v1262_v37  ;;  %v3676_v20 = vsub.f32 %v2871_v42, %v3050_v9  ;;  %v3677_v26 = vsub.f32 %v3654_v30, %v3050_v9  ;;  %v3682_v3 = vld [vmem:[#allocation22_spill] sm:$0xff] }
 0x574   : > { %v3215_v45 = vpack.c.bf16 %v3675_v54, %v3674_v4  ;;  %v3679_v31 = vsub.f32 %v3678_v12, %v3050_v9  ;;  %v3681_v62 = vsub.f32 %v3680_v38, %v3050_v9  ;;  %v3683_v40 = vsub.f32 %v3682_v3, %v3050_v9  ;;  %v3684_v54 = vld [vmem:[#allocation23_spill] sm:$0xff]  ;;  %v3245_v12 = vpop.eup %2229 }
 0x575   : > { %v3225_v61 = vpack.c.bf16 %v3677_v26, %v3676_v20  ;;  %v1295_v4 = vunpack.c.h.bf16 %v1261_v8  ;;  %v3685_v42 = vsub.f32 %v3684_v54, %v3050_v9  ;;  %v3241_v30 = vpack.c.bf16 %v1235_v18, %v1233_v41 }
 0x576   : > { %v1273_v49 = vpack.c.bf16 %v3681_v62, %v3679_v31  ;;  %v1275_v32 = vpack.c.bf16 %v1227_v28, %v3683_v40  ;;  %v3243_v20 = vpack.c.bf16 %v1239_v56, %v1237_v34  ;;  %v1296_v26 = vunpack.c.h.bf16 %v1262_v37  ;;  %v3251_v28 = vpop.eup %2231 }
 0x577   : > { %v3239_v47 = vpack.c.bf16 %v1231_v0, %v3685_v42  ;;  %v3247_v14 = vpack.c.bf16 %v1243_v24, %v1241_v50  ;;  %v3249_v31 = vpack.c.bf16 %v1247_v15, %v1245_v55  ;;  %v1297_v38 = vunpack.c.l.bf16 %v1263_v25 }
 0x578   : > { %v1357_v62 = vmul.f32 1.442695, %v1293_v46  ;;  %v3253_v8 = vpack.c.bf16 %v1208_v57, %v1206_v19  ;;  %v3255_v9 = vpack.c.bf16 %v1212_v22, %v1210_v36  ;;  %v1298_v41 = vunpack.c.l.bf16 %v3217_v10 }
 0x579   : > { %v1359_v0 = vmul.f32 1.442695, %v1294_v59  ;;  %v3258_v56 = vpack.c.bf16 %v1216_v52, %v1214_v21  ;;  %v3260_v34 = vpack.c.bf16 %v1220_v27, %v1218_v17  ;;  %v1321_v18 = vunpack.c.l.bf16 %v1275_v32 }
 0x57a   : > { %v1361_v24 = vmul.f32 1.442695, %v1295_v4  ;;  %v3262_v50 = vpack.c.bf16 %v1224_v33, %v1222_v23  ;;  %v3264_v55 = vpack.c.bf16 %v1228_v11, %v1226_v39  ;;  %v1299_v15 = vunpack.c.h.bf16 %v1263_v25 }
 0x57b   : > { %v1363_v37 = vmul.f32 1.442695, %v1296_v26  ;;  %v3266_v46 = vpack.c.bf16 %v1232_v5, %v1230_v43  ;;  %v1323_v19 = vunpack.c.h.bf16 %v1275_v32  ;;  %2233 = vpow2.f32 %v1357_v62 }
 0x57c   : > { %v1365_v22 = vmul.f32 1.442695, %v1297_v38  ;;  %v3268_v57 = vpack.c.bf16 %v1236_v1, %v1234_v13  ;;  %v1317_v36 = vunpack.c.l.bf16 %v1273_v49  ;;  %2235 = vpow2.f32 %v1359_v0 }
 0x57d   : > { %v1367_v52 = vmul.f32 1.442695, %v1298_v41  ;;  %v3270_v21 = vpack.c.bf16 %v1240_v51, %v1238_v48  ;;  %v1319_v17 = vunpack.c.h.bf16 %v1273_v49  ;;  %2237 = vpow2.f32 %v1361_v24  ;;  %v3686_v48 = vld [vmem:[#allocation27_spill] sm:$0xff]  ;;  %v3687_v51 = vld [vmem:[#allocation32_spill] sm:$0xff] }
 0x57e   : > { %v1413_v27 = vmul.f32 1.442695, %v1321_v18  ;;  %v3272_v23 = vpack.c.bf16 %v1244_v2, %v1242_v53  ;;  %v1301_v33 = vunpack.c.l.bf16 %v3199_v29  ;;  %2239 = vpow2.f32 %v1363_v37 }
 0x57f   : > { %v1369_v39 = vmul.f32 1.442695, %v1299_v15  ;;  %v3275_v11 = vpack.c.bf16 %v1248_v60, %v1246_v58  ;;  %v1303_v43 = vunpack.c.h.bf16 %v3199_v29  ;;  %2241 = vpow2.f32 %v1365_v22 }
 0x580   : > { %v1417_v5 = vmul.f32 1.442695, %v1323_v19  ;;  %v1313_v13 = vunpack.c.l.bf16 %v3225_v61  ;;  %2243 = vpow2.f32 %v1367_v52  ;;  %v1405_v1 = vmul.f32 1.442695, %v1317_v36 }
 0x581   : > { %v3281_v25 = vpack.c.bf16 %v3687_v51, %v3686_v48  ;;  %v3283_v2 = vpop.eup %2233  ;;  %v3285_v53 = vpack.c.bf16 %v1252_v6, %v1250_v63  ;;  %v1315_v59 = vunpack.c.h.bf16 %v3225_v61  ;;  %v1409_v58 = vmul.f32 1.442695, %v1319_v17 }
 0x582   : > { %2245 = vpow2.f32 %v1413_v27  ;;  %v3288_v60 = vpop.eup %2235  ;;  %v3688_v29 = vsub.f32 %v3000_v44, %v3067_v35  ;;  %v3689_v49 = vsub.f32 %v3023_v16, %v3067_v35  ;;  %v1305_v40 = vunpack.c.l.bf16 %v3207_v7 }
 0x583   : > { %2247 = vpow2.f32 %v1369_v39  ;;  %v1373_v32 = vmul.f32 1.442695, %v1301_v33  ;;  %1674 = vmatpush.bf16.msra.mxu1 %v3281_v25  ;;  %v2238_v63 = vpop.eup %2237  ;;  %v1300_v6 = vunpack.c.h.bf16 %v3217_v10  ;;  %v1307_v61 = vunpack.c.h.bf16 %v3207_v7 }
 0x584   : > { %v3296_v3 = vpack.c.bf16 %v3689_v49, %v3688_v29  ;;  %v1377_v4 = vmul.f32 1.442695, %v1303_v43  ;;  %2249 = vpow2.f32 %v1417_v5  ;;  %v3302_v54 = vpop.eup %2239  ;;  %v1302_v44 = vunpack.c.l.bf16 %v3253_v8 }
 0x585   : > { %v1309_v16 = vunpack.c.l.bf16 %v3215_v45  ;;  %v1397_v35 = vmul.f32 1.442695, %v1313_v13  ;;  %2251 = vpow2.f32 %v1405_v1  ;;  %v2242_v42 = vpop.eup %2241  ;;  %v1304_v26 = vunpack.c.h.bf16 %v3253_v8 }
 0x586   : > { %v1311_v38 = vunpack.c.h.bf16 %v3215_v45  ;;  %v1401_v62 = vmul.f32 1.442695, %v1315_v59  ;;  %2253 = vpow2.f32 %v1409_v58  ;;  %v3308_v10 = vpop.eup %2243  ;;  %v1306_v7 = vunpack.c.l.bf16 %v3255_v9 }
 0x587   : > { %v1308_v41 = vunpack.c.h.bf16 %v3255_v9  ;;  %2255 = vpow2.f32 %v1373_v32  ;;  %v1381_v0 = vmul.f32 1.442695, %v1305_v40  ;;  %v1310_v24 = vunpack.c.l.bf16 %v3258_v56 }
 0x588   : > { %v2246_v18 = vpop.eup %2245  ;;  %v1312_v15 = vunpack.c.h.bf16 %v3258_v56  ;;  %2257 = vpow2.f32 %v1377_v4  ;;  %v1385_v37 = vmul.f32 1.442695, %v1307_v61  ;;  %v1314_v45 = vunpack.c.l.bf16 %v3260_v34 }
 0x589   : > { %v2248_v8 = vpop.eup %2247  ;;  %v1316_v19 = vunpack.c.h.bf16 %v3260_v34  ;;  %v1389_v22 = vmul.f32 1.442695, %v1309_v16  ;;  %2259 = vpow2.f32 %v1397_v35  ;;  %v1318_v52 = vunpack.c.l.bf16 %v3262_v50 }
 0x58a   : > { %v2250_v36 = vpop.eup %2249  ;;  %v1320_v9 = vunpack.c.h.bf16 %v3262_v50  ;;  %v1393_v17 = vmul.f32 1.442695, %v1311_v38  ;;  %2261 = vpow2.f32 %v1401_v62  ;;  %v1322_v33 = vunpack.c.l.bf16 %v3264_v55 }
 0x58b   : > { %v2252_v27 = vpop.eup %2251  ;;  %v1371_v56 = vmul.f32 1.442695, %v1300_v6  ;;  %2263 = vpow2.f32 %v1381_v0  ;;  %v3319_v39 = vpack.c.bf16 %v2250_v36, %v2246_v18  ;;  %v1324_v5 = vunpack.c.h.bf16 %v3264_v55  ;;  %v3690_v36 = vld [vmem:[#allocation38_spill] sm:$0xff] }
 0x58c   : > { %v2254_v43 = vpop.eup %2253  ;;  %v1325_v34 = vunpack.c.l.bf16 %v3239_v47  ;;  %v1375_v13 = vmul.f32 1.442695, %v1302_v44  ;;  %2265 = vpow2.f32 %v1385_v37  ;;  %v1326_v48 = vunpack.c.l.bf16 %v3266_v46 }
 0x58d   : > { %v2256_v1 = vpop.eup %2255  ;;  %v1327_v50 = vunpack.c.h.bf16 %v3239_v47  ;;  %v1379_v51 = vmul.f32 1.442695, %v1304_v26  ;;  %2267 = vpow2.f32 %v1389_v22  ;;  %1655 = vmatpush.bf16.msra.mxu0 %v3319_v39  ;;  %v1383_v58 = vmul.f32 1.442695, %v1306_v7 }
 0x58e   : > { %v2258_v59 = vpop.eup %2257  ;;  %2269 = vpow2.f32 %v1393_v17  ;;  %v3326_v29 = vpack.c.bf16 %v2248_v8, %v2242_v42  ;;  %v3329_v55 = vpack.c.bf16 %v2238_v63, %v3283_v2  ;;  %v1328_v40 = vunpack.c.h.bf16 %v3266_v46 }
 0x58f   : > { %v2260_v49 = vpop.eup %2259  ;;  %2271 = vpow2.f32 %v1371_v56  ;;  %v1387_v32 = vmul.f32 1.442695, %v1308_v41  ;;  %v3332_v6 = vpack.c.bf16 %v2254_v43, %v2252_v27  ;;  %v1391_v4 = vmul.f32 1.442695, %v1310_v24 }
 0x590   : > { %v2262_v61 = vpop.eup %2261  ;;  %2273 = vpow2.f32 %v1375_v13  ;;  %v1517_v44 = vunpack.c.l.bf16 %v3329_v55  ;;  %v1519_v16 = vunpack.c.h.bf16 %v3329_v55  ;;  %v1329_v42 = vunpack.c.l.bf16 %v3241_v30 }
 0x591   : > { %v2264_v35 = vpop.eup %2263  ;;  %2275 = vpow2.f32 %v1379_v51  ;;  %v1395_v2 = vmul.f32 1.442695, %v1312_v15  ;;  %v1399_v63 = vmul.f32 1.442695, %v1314_v45  ;;  %1656 = vmatpush.bf16.msra.mxu0 %v3332_v6  ;;  %v3338_v38 = vpack.c.bf16 %v2258_v59, %v2256_v1 }
 0x592   : > { %v2266_v26 = vpop.eup %2265  ;;  %2277 = vpow2.f32 %v1383_v58  ;;  %v1521_v62 = vunpack.c.l.bf16 %v3326_v29  ;;  %v1581_v7 = vadd.f32 %v1519_v16, %v1517_v44  ;;  %v1330_v0 = vunpack.c.l.bf16 %v3268_v57 }
 0x593   : > { %v2268_v41 = vpop.eup %2267  ;;  %2279 = vpow2.f32 %v1387_v32  ;;  %v1403_v18 = vmul.f32 1.442695, %v1316_v19  ;;  %v3342_v24 = vpack.c.bf16 %v2262_v61, %v2260_v49  ;;  %v1407_v15 = vmul.f32 1.442695, %v1318_v52 }
 0x594   : > { %v2270_v37 = vpop.eup %2269  ;;  %2281 = vpow2.f32 %v1391_v4  ;;  %v1523_v8 = vunpack.c.h.bf16 %v3326_v29  ;;  %v1582_v45 = vadd.f32 %v1581_v7, %v1521_v62  ;;  %v1349_v17 = vunpack.c.l.bf16 %v3690_v36  ;;  %v3691_v4 = vld [vmem:[#allocation37_spill] sm:$0xff] }
 0x595   : > { %v3345_v22 = vpop.eup %2271  ;;  %2283 = vpow2.f32 %v1395_v2  ;;  %v1411_v27 = vmul.f32 1.442695, %v1320_v9  ;;  %v1415_v56 = vmul.f32 1.442695, %v1322_v33  ;;  %1657 = vmatpush.bf16.msra.mxu0 %v3342_v24  ;;  %v1491_v19 = vpack.c.bf16 %v2266_v26, %v2264_v35 }
 0x596   : > { %v3349_v43 = vpop.eup %2273  ;;  %2285 = vpow2.f32 %v1399_v63  ;;  %v1525_v13 = vunpack.c.l.bf16 %v3338_v38  ;;  %v1583_v1 = vadd.f32 %v1582_v45, %v1523_v8  ;;  %v1351_v51 = vunpack.c.h.bf16 %v3690_v36 }
 0x597   : > { %v3352_v52 = vpop.eup %2275  ;;  %2287 = vpow2.f32 %v1403_v18  ;;  %v1419_v59 = vmul.f32 1.442695, %v1324_v5  ;;  %v1493_v58 = vpack.c.bf16 %v2270_v37, %v2268_v41  ;;  %v1421_v9 = vmul.f32 1.442695, %v1325_v34 }
 0x598   : > { %v3355_v49 = vpop.eup %2277  ;;  %2289 = vpow2.f32 %v1407_v15  ;;  %v1527_v33 = vunpack.c.h.bf16 %v3338_v38  ;;  %v1584_v32 = vadd.f32 %v1583_v1, %v1525_v13  ;;  %v1345_v44 = vunpack.c.l.bf16 %v3691_v4 }
 0x599   : > { %v3358_v61 = vpop.eup %2279  ;;  %v1347_v16 = vunpack.c.h.bf16 %v3691_v4  ;;  %2291 = vpow2.f32 %v1411_v27  ;;  %v1425_v35 = vmul.f32 1.442695, %v1327_v50  ;;  %1658 = vmatpush.bf16.msra.mxu0 %v1493_v58  ;;  %v1469_v2 = vmul.f32 1.442695, %v1349_v17 }
 0x59a   : > { %v3364_v5 = vpop.eup %2281  ;;  %2293 = vpow2.f32 %v1415_v56  ;;  %v1529_v63 = vunpack.c.l.bf16 %v1491_v19  ;;  %v1585_v34 = vadd.f32 %v1584_v32, %v1527_v33  ;;  %v1331_v62 = vunpack.c.h.bf16 %v3241_v30 }
 0x59b   : > { %v3366_v26 = vpop.eup %2283  ;;  %v1333_v7 = vunpack.c.l.bf16 %v3243_v20  ;;  %2295 = vpow2.f32 %v1419_v59  ;;  %v1429_v41 = vmul.f32 1.442695, %v1329_v42  ;;  %v1473_v47 = vmul.f32 1.442695, %v1351_v51 }
 0x59c   : > { %v3370_v18 = vpop.eup %2285  ;;  %2297 = vpow2.f32 %v1421_v9  ;;  %v1531_v50 = vunpack.c.h.bf16 %v1491_v19  ;;  %v1586_v37 = vadd.f32 %v1585_v34, %v1529_v63  ;;  %v1341_v8 = vunpack.c.l.bf16 %v3249_v31 }
 0x59d   : > { %v3372_v15 = vpop.eup %2287  ;;  %v1343_v45 = vunpack.c.h.bf16 %v3249_v31  ;;  %2299 = vpow2.f32 %v1425_v35  ;;  %v1461_v36 = vmul.f32 1.442695, %v1345_v44  ;;  %1659 = vmatpush.bf16.msra.mxu0 %v1491_v19  ;;  %v1465_v17 = vmul.f32 1.442695, %v1347_v16 }
 0x59e   : > { %v3376_v30 = vpop.eup %2289  ;;  %2301 = vpow2.f32 %v1469_v2  ;;  %v1533_v42 = vunpack.c.l.bf16 %v1493_v58  ;;  %v1587_v27 = vadd.f32 %v1586_v37, %v1531_v50  ;;  %v1332_v13 = vunpack.c.h.bf16 %v3268_v57 }
 0x59f   : > { %v3378_v56 = vpop.eup %2291  ;;  %v1335_v1 = vunpack.c.h.bf16 %v3243_v20  ;;  %2303 = vpow2.f32 %v1429_v41  ;;  %v1433_v51 = vmul.f32 1.442695, %v1331_v62  ;;  %v1437_v9 = vmul.f32 1.442695, %v1333_v7 }
 0x5a0   : > { %v2294_v59 = vpop.eup %2293  ;;  %2305 = vpow2.f32 %v1473_v47  ;;  %v1535_v31 = vunpack.c.h.bf16 %v1493_v58  ;;  %v1588_v33 = vadd.f32 %v1587_v27, %v1533_v42  ;;  %v1337_v32 = vunpack.c.l.bf16 %v3247_v14 }
 0x5a1   : > { %v2296_v19 = vpop.eup %2295  ;;  %v1339_v4 = vunpack.c.h.bf16 %v3247_v14  ;;  %v1453_v44 = vmul.f32 1.442695, %v1341_v8  ;;  %2307 = vpow2.f32 %v1461_v36  ;;  %1660 = vmatpush.bf16.msra.mxu0 %v3338_v38  ;;  %v1457_v35 = vmul.f32 1.442695, %v1343_v45 }
 0x5a2   : > { %v2298_v16 = vpop.eup %2297  ;;  %2309 = vpow2.f32 %v1465_v17  ;;  %v1537_v20 = vunpack.c.l.bf16 %v3342_v24  ;;  %v1589_v2 = vadd.f32 %v1588_v33, %v1535_v31  ;;  %v1334_v34 = vunpack.c.l.bf16 %v3270_v21 }
 0x5a3   : > { %v2300_v63 = vpop.eup %2299  ;;  %2311 = vpow2.f32 %v1433_v51  ;;  %v3389_v58 = vpack.c.bf16 %v3345_v22, %v3308_v10  ;;  %v3393_v14 = vpack.c.bf16 %v3302_v54, %v3288_v60  ;;  %v1441_v38 = vmul.f32 1.442695, %v1335_v1 }
 0x5a4   : > { %v2302_v62 = vpop.eup %2301  ;;  %2313 = vpow2.f32 %v1437_v9  ;;  %v1539_v7 = vunpack.c.h.bf16 %v3342_v24  ;;  %v1590_v41 = vadd.f32 %v1589_v2, %v1537_v20  ;;  %v1445_v50 = vmul.f32 1.442695, %v1337_v32 }
 0x5a5   : > { %v2304_v47 = vpop.eup %2303  ;;  %2315 = vpow2.f32 %v1453_v44  ;;  %1661 = vmatpush.bf16.msra.mxu0 %v3326_v29  ;;  %v1518_v37 = vunpack.c.l.bf16 %v3393_v14  ;;  %v1520_v10 = vunpack.c.h.bf16 %v3393_v14  ;;  %v1449_v8 = vmul.f32 1.442695, %v1339_v4 }
 0x5a6   : > { %v2306_v22 = vpop.eup %2305  ;;  %2317 = vpow2.f32 %v1457_v35  ;;  %v1541_v60 = vunpack.c.l.bf16 %v3332_v6  ;;  %v1591_v54 = vadd.f32 %v1590_v41, %v1539_v7  ;;  %v3404_v24 = vpack.c.bf16 %v3352_v52, %v3349_v43 }
 0x5a7   : > { %v2308_v45 = vpop.eup %2307  ;;  %v3400_v36 = vpack.c.bf16 %v2306_v22, %v2302_v62  ;;  %v1522_v17 = vunpack.c.l.bf16 %v3389_v58  ;;  %v1618_v29 = vadd.f32 %v1520_v10, %v1518_v37  ;;  %2319 = vpow2.f32 %v1441_v38 }
 0x5a8   : > { %v2310_v42 = vpop.eup %2309  ;;  %v1543_v27 = vunpack.c.h.bf16 %v3332_v6  ;;  %v1592_v1 = vadd.f32 %v1591_v54, %v1541_v60  ;;  %v3408_v51 = vpack.c.bf16 %v2296_v19, %v2294_v59  ;;  %v1336_v31 = vunpack.c.h.bf16 %v3270_v21 }
 0x5a9   : > { %v2312_v9 = vpop.eup %2311  ;;  %2321 = vpow2.f32 %v1445_v50  ;;  %1675 = vmatpush.bf16.msra.mxu1 %v3400_v36  ;;  %1662 = vmatpush.bf16.msra.mxu0 %v3329_v55  ;;  %v1524_v43 = vunpack.c.h.bf16 %v3389_v58  ;;  %v1619_v52 = vadd.f32 %v1618_v29, %v1522_v17  ;;  %v1545_v32 = vunpack.c.l.bf16 %v3319_v39 }
 0x5aa   : > { %v2314_v33 = vpop.eup %2313  ;;  %2323 = vpow2.f32 %v1449_v8  ;;  %v3415_v4 = vpack.c.bf16 %v2300_v63, %v2298_v16  ;;  %v1593_v6 = vadd.f32 %v1592_v1, %v1543_v27  ;;  %v3418_v19 = vpack.c.bf16 %v2310_v42, %v2308_v45  ;;  %v3692_v63 = vld [vmem:[#allocation13_spill] sm:$0xff] }
 0x5ab   : > { %v2316_v59 = vpop.eup %2315  ;;  %v3422_v44 = vpack.c.bf16 %v3358_v61, %v3355_v49  ;;  %v1526_v55 = vunpack.c.l.bf16 %v3404_v24  ;;  %v1620_v35 = vadd.f32 %v1619_v52, %v1524_v43  ;;  %v1338_v2 = vunpack.c.l.bf16 %v3272_v23 }
 0x5ac   : > { %v2318_v20 = vpop.eup %2317  ;;  %v1547_v62 = vunpack.c.h.bf16 %v3319_v39  ;;  %v1594_v16 = vadd.f32 %v1593_v6, %v1545_v32  ;;  %1663 = vmatmul.bf16.vlgmr.msra.gmra.mxu0 %v3692_v63  ;;  %v3430_v38 = vpack.c.bf16 %v3378_v56, %v3376_v30  ;;  %v1340_v7 = vunpack.c.h.bf16 %v3272_v23 }
 0x5ad   : > { %1693 = vmatpush.bf16.msrb.mxu0 %v3408_v51  ;;  %v1342_v49 = vunpack.c.l.bf16 %v3275_v11  ;;  %1676 = vmatpush.bf16.msra.mxu1 %v3418_v19  ;;  %v1528_v61 = vunpack.c.h.bf16 %v3404_v24  ;;  %v1621_v41 = vadd.f32 %v1620_v35, %v1526_v55  ;;  %v2320_v50 = vpop.eup %2319  ;;  %v1344_v37 = vunpack.c.h.bf16 %v3275_v11 }
 0x5ae   : > { %v3437_v39 = vpack.c.bf16 %v2312_v9, %v2304_v47  ;;  %v1549_v10 = vunpack.c.l.bf16 %v3415_v4  ;;  %v1595_v22 = vadd.f32 %v1594_v16, %v1547_v62  ;;  %v3441_v56 = vpack.c.bf16 %v2318_v20, %v2316_v59 }
 0x5af   : > { %v2322_v30 = vpop.eup %2321  ;;  %v1494_v8 = vpack.c.bf16 %v3366_v26, %v3364_v5  ;;  %v1530_v60 = vunpack.c.l.bf16 %v3422_v44  ;;  %v1622_v54 = vadd.f32 %v1621_v41, %v1528_v61  ;;  %v1346_v17 = vunpack.c.l.bf16 %v3285_v53 }
 0x5b0   : > { %v2324_v45 = vpop.eup %2323  ;;  %v1551_v47 = vunpack.c.h.bf16 %v3415_v4  ;;  %v1596_v29 = vadd.f32 %v1595_v22, %v1549_v10  ;;  %v1496_v42 = vpack.c.bf16 %v3372_v15, %v3370_v18  ;;  %v1350_v27 = vunpack.c.l.bf16 %v3296_v3 }
 0x5b1   : > { %1694 = vmatpush.bf16.msrb.mxu0 %v3430_v38  ;;  %v1423_v1 = vmul.f32 1.442695, %v1326_v48  ;;  %1677 = vmatpush.bf16.msra.mxu1 %v3441_v56  ;;  %v1532_v5 = vunpack.c.h.bf16 %v3422_v44  ;;  %v1623_v26 = vadd.f32 %v1622_v54, %v1530_v60  ;;  %v1427_v9 = vmul.f32 1.442695, %v1328_v40 }
 0x5b2   : > { %v1505_v43 = vpack.c.bf16 %v2320_v50, %v2314_v33  ;;  %v1553_v52 = vunpack.c.l.bf16 %v3437_v39  ;;  %v1597_v32 = vadd.f32 %v1596_v29, %v1551_v47  ;;  %v1352_v18 = vunpack.c.h.bf16 %v3296_v3 }
 0x5b3   : > { %v1507_v15 = vpack.c.bf16 %v2324_v45, %v2322_v30  ;;  %v1534_v6 = vunpack.c.l.bf16 %v1494_v8  ;;  %v1624_v59 = vadd.f32 %v1623_v26, %v1532_v5  ;;  %v1348_v48 = vunpack.c.h.bf16 %v3285_v53 }
 0x5b4   : > { %v1431_v55 = vmul.f32 1.442695, %v1330_v0  ;;  %v1555_v35 = vunpack.c.h.bf16 %v3437_v39  ;;  %v1598_v20 = vadd.f32 %v1597_v32, %v1553_v52  ;;  %2325 = vpow2.f32 %v1423_v1 }
 0x5b5   : > { %1695 = vmatpush.bf16.msrb.mxu0 %v1496_v42  ;;  %v1435_v46 = vmul.f32 1.442695, %v1332_v13  ;;  %1678 = vmatpush.bf16.msra.mxu1 %v1507_v15  ;;  %v1536_v40 = vunpack.c.h.bf16 %v1494_v8  ;;  %v1625_v33 = vadd.f32 %v1624_v59, %v1534_v6  ;;  %2327 = vpow2.f32 %v1427_v9 }
 0x5b6   : > { %v1471_v3 = vmul.f32 1.442695, %v1350_v27  ;;  %v1557_v62 = vunpack.c.l.bf16 %v1505_v43  ;;  %v1599_v16 = vadd.f32 %v1598_v20, %v1555_v35  ;;  %v1439_v53 = vmul.f32 1.442695, %v1334_v34  ;;  %v3693_v27 = vld [vmem:[#allocation15_spill] sm:$0xff]  ;;  %v3694_v35 = vld [vmem:[#allocation14_spill] sm:$0xff] }
 0x5b7   : > { %v1475_v61 = vmul.f32 1.442695, %v1352_v18  ;;  %v1538_v0 = vunpack.c.l.bf16 %v1496_v42  ;;  %v1626_v41 = vadd.f32 %v1625_v33, %v1536_v40  ;;  %2329 = vpow2.f32 %v1431_v55 }
 0x5b8   : > { %v1443_v50 = vmul.f32 1.442695, %v1336_v31  ;;  %v1559_v57 = vunpack.c.h.bf16 %v1505_v43  ;;  %v1600_v13 = vadd.f32 %v1599_v16, %v1557_v62  ;;  %2331 = vpow2.f32 %v1435_v46 }
 0x5b9   : > { %1696 = vmatpush.bf16.msrb.mxu0 %v1494_v8  ;;  %v1447_v10 = vmul.f32 1.442695, %v1338_v2  ;;  %1679 = vmatpush.bf16.msra.mxu1 %v1505_v43  ;;  %v1540_v22 = vunpack.c.h.bf16 %v1496_v42  ;;  %v1627_v30 = vadd.f32 %v1626_v41, %v1538_v0  ;;  %v1463_v60 = vmul.f32 1.442695, %v1346_v17 }
 0x5ba   : > { %2333 = vpow2.f32 %v1471_v3  ;;  %v1561_v8 = vunpack.c.l.bf16 %v1507_v15  ;;  %v1601_v54 = vadd.f32 %v1600_v13, %v1559_v57  ;;  %v2326_v34 = vpop.eup %2325  ;;  %v1467_v45 = vmul.f32 1.442695, %v1348_v48 }
 0x5bb   : > { %2335 = vpow2.f32 %v1475_v61  ;;  %v1542_v47 = vunpack.c.l.bf16 %v3430_v38  ;;  %v1628_v21 = vadd.f32 %v1627_v30, %v1540_v22  ;;  %v2328_v31 = vpop.eup %2327  ;;  %v1451_v2 = vmul.f32 1.442695, %v1340_v7 }
 0x5bc   : > { %2337 = vpow2.f32 %v1439_v53  ;;  %v1563_v29 = vunpack.c.h.bf16 %v1507_v15  ;;  %v1602_v42 = vadd.f32 %v1601_v54, %v1561_v8  ;;  %1668 = vmatmul.bf16.gmra.mxu0 %v3693_v27  ;;  %v1455_v17 = vmul.f32 1.442695, %v1342_v49 }
 0x5bd   : > { %1697 = vmatpush.bf16.msrb.mxu0 %v3422_v44  ;;  %2339 = vpow2.f32 %v1443_v50  ;;  %1680 = vmatpush.bf16.msra.mxu1 %v3437_v39  ;;  %v1544_v44 = vunpack.c.h.bf16 %v3430_v38  ;;  %v1629_v1 = vadd.f32 %v1628_v21, %v1542_v47  ;;  %v2330_v5 = vpop.eup %2329  ;;  %v1459_v26 = vmul.f32 1.442695, %v1344_v37 }
 0x5be   : > { %2341 = vpow2.f32 %v1463_v60  ;;  %v1565_v23 = vunpack.c.l.bf16 %v3441_v56  ;;  %v1603_v7 = vadd.f32 %v1602_v42, %v1563_v29  ;;  %v2332_v9 = vpop.eup %2331  ;;  %v1546_v43 = vunpack.c.l.bf16 %v3408_v51 }
 0x5bf   : > { %2343 = vpow2.f32 %v1467_v45  ;;  %v3483_v49 = vpack.c.bf16 %v2328_v31, %v2326_v34  ;;  %v1630_v39 = vadd.f32 %v1629_v1, %v1544_v44  ;;  %v1567_v38 = vunpack.c.h.bf16 %v3441_v56 }
 0x5c0   : > { %v2334_v52 = vpop.eup %2333  ;;  %2345 = vpow2.f32 %v1447_v10  ;;  %v1604_v32 = vadd.f32 %v1603_v7, %v1565_v23  ;;  %v3488_v11 = vpack.c.bf16 %v3251_v28, %v3245_v12  ;;  %v1569_v6 = vunpack.c.l.bf16 %v3418_v19 }
 0x5c1   : > { %1698 = vmatpush.bf16.msrb.mxu0 %v3404_v24  ;;  %v2336_v37 = vpop.eup %2335  ;;  %2347 = vpow2.f32 %v1451_v2  ;;  %1681 = vmatpush.bf16.msra.mxu1 %v3415_v4  ;;  %v1548_v24 = vunpack.c.h.bf16 %v3408_v51  ;;  %v1631_v18 = vadd.f32 %v1630_v39, %v1546_v43  ;;  %v1504_v12 = vpack.c.bf16 %v2332_v9, %v2330_v5  ;;  %v3695_v5 = vld [vmem:[#allocation16_spill] sm:$0xff] }
 0x5c2   : > { %v2338_v15 = vpop.eup %2337  ;;  %2349 = vpow2.f32 %v1455_v17  ;;  %v1605_v59 = vadd.f32 %v1604_v32, %v1567_v38  ;;  %v1550_v28 = vunpack.c.l.bf16 %v3483_v49  ;;  %v1571_v4 = vunpack.c.h.bf16 %v3418_v19 }
 0x5c3   : > { %v2340_v56 = vpop.eup %2339  ;;  %2351 = vpow2.f32 %v1459_v26  ;;  %v1632_v48 = vadd.f32 %v1631_v18, %v1548_v24  ;;  %v1514_v20 = vpack.c.bf16 %v2336_v37, %v2334_v52  ;;  %v1552_v40 = vunpack.c.h.bf16 %v3483_v49 }
 0x5c4   : > { %v2342_v55 = vpop.eup %2341  ;;  %v1606_v51 = vadd.f32 %v1605_v59, %v1569_v6  ;;  %1682 = vmatmul.bf16.vlgmr.msra.gmra.mxu1 %v3694_v35  ;;  %v1506_v53 = vpack.c.bf16 %v2340_v56, %v2338_v15  ;;  %v1554_v61 = vunpack.c.l.bf16 %v1504_v12  ;;  %v1575_v41 = vunpack.c.h.bf16 %v3400_v36 }
 0x5c5   : > { %1712 = vmatpush.bf16.msrb.mxu1 %v3488_v11  ;;  %1699 = vmatpush.bf16.msrb.mxu0 %v3389_v58  ;;  %v2344_v46 = vpop.eup %2343  ;;  %v1633_v33 = vadd.f32 %v1632_v48, %v1550_v28  ;;  %v1573_v58 = vunpack.c.l.bf16 %v3400_v36  ;;  %v1556_v10 = vunpack.c.h.bf16 %v1504_v12  ;;  %v1577_v30 = vunpack.c.l.bf16 %v3281_v25 }
 0x5c6   : > { %v2346_v3 = vpop.eup %2345  ;;  %v1607_v62 = vadd.f32 %v1606_v51, %v1571_v4  ;;  %v1512_v57 = vpack.c.bf16 %v2344_v46, %v2342_v55  ;;  %v1558_v54 = vunpack.c.l.bf16 %v1506_v53  ;;  %v1560_v21 = vunpack.c.h.bf16 %v1506_v53 }
 0x5c7   : > { %v2348_v16 = vpop.eup %2347  ;;  %v1634_v0 = vadd.f32 %v1633_v33, %v1552_v40  ;;  %v1574_v43 = vunpack.c.l.bf16 %v1514_v20  ;;  %v1576_v52 = vunpack.c.h.bf16 %v1514_v20  ;;  %v1578_v32 = vunpack.c.l.bf16 %v3488_v11 }
 0x5c8   : > { %v2350_v19 = vpop.eup %2349  ;;  %v1608_v50 = vadd.f32 %v1607_v62, %v1573_v58  ;;  %v1508_v8 = vpack.c.bf16 %v2348_v16, %v2346_v3  ;;  %v1572_v9 = vunpack.c.h.bf16 %v1512_v57  ;;  %v1580_v24 = vunpack.c.h.bf16 %v3488_v11 }
 0x5c9   : > { %1713 = vmatpush.bf16.msrb.mxu1 %v1514_v20  ;;  %1700 = vmatpush.bf16.msrb.mxu0 %v3393_v14  ;;  %v2352_v13 = vpop.eup %2351  ;;  %v1635_v22 = vadd.f32 %v1634_v0, %v1554_v61  ;;  %v1579_v14 = vunpack.c.h.bf16 %v3281_v25  ;;  %v1570_v25 = vunpack.c.l.bf16 %v1512_v57 }
 0x5ca   : > { %v1609_v60 = vadd.f32 %v1608_v50, %v1575_v41  ;;  %v1510_v47 = vpack.c.bf16 %v2352_v13, %v2350_v19  ;;  %v1562_v2 = vunpack.c.l.bf16 %v1508_v8  ;;  %v1564_v42 = vunpack.c.h.bf16 %v1508_v8 }
 0x5cb   : > { %v1636_v34 = vadd.f32 %v1635_v22, %v1556_v10 }
 0x5cc   : > { %v1610_v45 = vadd.f32 %v1609_v60, %v1577_v30  ;;  %1701 = vmatmul.bf16.vlgmr.msrb.gmra.mxu0 %v3692_v63  ;;  %v1566_v44 = vunpack.c.l.bf16 %v1510_v47  ;;  %v1568_v26 = vunpack.c.h.bf16 %v1510_v47 }
 0x5cd   : > { %1714 = vmatpush.bf16.msrb.mxu1 %v1512_v57  ;;  %v1637_v36 = vadd.f32 %v1636_v34, %v1558_v54 }
 0x5ce   : > { %v1611_v31 = vadd.f32 %v1610_v45, %v1579_v14 }
 0x5cf   : > { %v1638_v29 = vadd.f32 %v1637_v36, %v1560_v21 }
 0x5d1   : > { %1715 = vmatpush.bf16.msrb.mxu1 %v1510_v47  ;;  %v1639_v17 = vadd.f32 %v1638_v29, %v1562_v2 }
 0x5d3   : > { %v1640_v1 = vadd.f32 %v1639_v17, %v1564_v42 }
 0x5d4   : > { %1687 = vmatmul.bf16.gmra.mxu1 %v3695_v5 }
 0x5d5   : > { %1716 = vmatpush.bf16.msrb.mxu1 %v1508_v8  ;;  %v1641_v23 = vadd.f32 %v1640_v1, %v1566_v44 }
 0x5d7   : > { %v1642_v7 = vadd.f32 %v1641_v23, %v1568_v26 }
 0x5d9   : > { %1717 = vmatpush.bf16.msrb.mxu1 %v1506_v53  ;;  %v1643_v63 = vadd.f32 %v1642_v7, %v1570_v25 }
 0x5db   : > { %v1644_v39 = vadd.f32 %v1643_v63, %v1572_v9 }
 0x5dc   : > { %1706 = vmatmul.bf16.gmra.mxu0 %v3693_v27 }
 0x5dd   : > { %1718 = vmatpush.bf16.msrb.mxu1 %v1504_v12  ;;  %v1645_v38 = vadd.f32 %v1644_v39, %v1574_v43  ;;  %v1612_v12 = vrot.slane %v1611_v31, 4 }
 0x5df   : > { %v1646_v37 = vadd.f32 %v1645_v38, %v1576_v52  ;;  %v1613_v48 = vadd.f32 %v1612_v12, %v1611_v31 }
 0x5e1   : > { %1719 = vmatpush.bf16.msrb.mxu1 %v3483_v49  ;;  %v1647_v18 = vadd.f32 %v1646_v37, %v1578_v32  ;;  %v1614_v4 = vrot.slane %v1613_v48, 2 }
 0x5e3   : > { %v1648_v15 = vadd.f32 %v1647_v18, %v1580_v24  ;;  %v1615_v46 = vadd.f32 %v1614_v4, %v1613_v48  ;;  %v2120_v18 = vld [vmem:[#allocation6] sm:$0xff]  ;;  %v1769_v4 = vpop.permute.xlu1 %1768 }
 0x5e4   : > { %1720 = vmatmul.bf16.vlgmr.msrb.gmra.mxu1 %v3694_v35 }
 0x5e5   : > { %v1649_v28 = vrot.slane %v1648_v15, 4  ;;  %v1616_v33 = vrot.slane %v1615_v46, 1 }
 0x5e7   : > { %v1650_v49 = vadd.f32 %v1649_v28, %v1648_v15  ;;  %v1617_v35 = vadd.f32 %v1616_v33, %v1615_v46  ;;  %v2121_v15 = vld [vmem:[#allocation6 + $0x8] sm:$0xff]  ;;  %v2357_v28 = vld [vmem:[%s2655_s24] sm:$0xff] }
 0x5e9   : > { %v1651_v51 = vrot.slane %v1650_v49, 2  ;;  %2353 = vrcp.f32 %v1617_v35 }
 0x5eb   : > { %v1652_v40 = vadd.f32 %v1651_v51, %v1650_v49 }
 0x5ed   : > { %v1653_v3 = vrot.slane %v1652_v40, 1 }
 0x5ef   : > { %v1654_v16 = vadd.f32 %v1653_v3, %v1652_v40  ;;  %v2354_v0 = vpop.eup %2353  ;;  %v2359_v40 = vld [vmem:[%s2655_s24 + $0x10] sm:$0xff]  ;;  %v2360_v3 = vld [vmem:[%s2655_s24 + $0x18] sm:$0xff] }
 0x5f1   : > { %2355 = vrcp.f32 %v1654_v16 }
 0x5f4   : > { %1725 = vmatmul.bf16.gmra.mxu1 %v3695_v5 }
 0x5f7   : > { %v2356_v41 = vpop.eup %2355 }
 0x629   : > { %v1664_v6 = vpop.f32.mrf.mxu0 }
 0x631   : > { %v1666_v59 = vpop.f32.mrf.mxu0 }
 0x639   : > { %v1669_v27 = vpop.f32.mrf.mxu0 }
 0x641   : > { %v1683_v56 = vpop.f32.mrf.mxu1  ;;  %v1671_v20 = vpop.f32.mrf.mxu0 }
 0x642   : > { %v1684_v53 = vadd.f32 %v1683_v56, %v1664_v6  ;;  %v1764_v6 = vpop.permute.xlu2 %1763 }
 0x644   : > { %v1733_v57 = vmul.f32 %v2354_v0, %v1684_v53 }
 0x649   : > { %v1685_v55 = vpop.f32.mrf.mxu1  ;;  %v1702_v62 = vpop.f32.mrf.mxu0 }
 0x64a   : > { %v1686_v22 = vadd.f32 %v1685_v55, %v1666_v59  ;;  %v2358_v55 = vld [vmem:[%s2655_s24 + $0x8] sm:$0xff] }
 0x64c   : > { %v1735_v8 = vmul.f32 %v2354_v0, %v1686_v22 }
 0x651   : > { %v1688_v11 = vpop.f32.mrf.mxu1  ;;  %v1704_v50 = vpop.f32.mrf.mxu0 }
 0x652   : > { %v1689_v45 = vadd.f32 %v1688_v11, %v1669_v27 }
 0x654   : > { %v1737_v36 = vmul.f32 %v2354_v0, %v1689_v45 }
 0x659   : > { %v1690_v58 = vpop.f32.mrf.mxu1  ;;  %v1707_v34 = vpop.f32.mrf.mxu0 }
 0x65a   : > { %v1691_v42 = vadd.f32 %v1690_v58, %v1671_v20  ;;  %v1774_v58 = vpop.permute.xlu2 %1773 }
 0x65c   : > { %v1739_v1 = vmul.f32 %v2354_v0, %v1691_v42  ;;  %v2361_v0 = vld [vmem:[%s2655_s24 + $0x20] sm:$0xff] }
 0x661   : > { %v1721_v61 = vpop.f32.mrf.mxu1  ;;  %v1709_v29 = vpop.f32.mrf.mxu0 }
 0x662   : > { %v1722_v19 = vadd.f32 %v1721_v61, %v1702_v62 }
 0x664   : > { %v1734_v13 = vmul.f32 %v2356_v41, %v1722_v19 }
 0x666   : > { %v1741_v10 = vpack.c.bf16 %v1734_v13, %v1733_v57  ;;  %v1779_v57 = vpop.permute.xlu1 %1778 }
 0x668   : > { %1745 = vst [vmem:[#allocation2] sm:$0xff] %v1741_v10 }
 0x669   : > { %v1723_v30 = vpop.f32.mrf.mxu1 }
 0x66a   : > { %v1724_v60 = vadd.f32 %v1723_v30, %v1704_v50 }
 0x66c   : > { %v1736_v54 = vmul.f32 %v2356_v41, %v1724_v60  ;;  %v2363_v60 = vld [vmem:[%s2655_s24 + $0x30] sm:$0xff] }
 0x66e   : > { %v1742_v14 = vpack.c.bf16 %v1736_v54, %v1735_v8  ;;  %v2364_v54 = vld [vmem:[%s2655_s24 + $0x38] sm:$0xff] }
 0x66f   : > { %v2090_v38 = vld [vmem:[#allocation2] sm:$0xf]  ;;  %v2122_v32 = vld [vmem:[#allocation2 + $0x4] sm:$0xf] }
 0x670   : > { %1746 = vst [vmem:[#allocation2 + $0x8] sm:$0xff] %v1742_v14 }
 0x671   : > { %v1726_v47 = vpop.f32.mrf.mxu1 }
 0x672   : > { %v1727_v21 = vadd.f32 %v1726_v47, %v1707_v34 }
 0x674   : > { %v1738_v31 = vmul.f32 %v2356_v41, %v1727_v21 }
 0x676   : > { %v1743_v2 = vpack.c.bf16 %v1738_v31, %v1737_v36 }
 0x677   : > { %v2123_v39 = vld [vmem:[#allocation2 + $0x4] sm:$0xf0]  ;;  %v2092_v52 = vld [vmem:[#allocation2 + $0x8] sm:$0xf0] }
 0x678   : > { %1747 = vst [vmem:[#allocation2 + $0x10] sm:$0xff] %v1743_v2  ;;  %v2091_v37 = vor.u32 %v2123_v39, %v2090_v38  ;;  %v2095_v24 = vor.u32 %v2122_v32, %v2092_v52 }
 0x679   : > { %v1728_v17 = vpop.f32.mrf.mxu1 }
 0x67a   : > { %v1729_v44 = vadd.f32 %v1728_v17, %v1709_v29 }
 0x67c   : > { %v1740_v5 = vmul.f32 %v2356_v41, %v1729_v44  ;;  %v2362_v41 = vld [vmem:[%s2655_s24 + $0x28] sm:$0xff] }
 0x67e   : > { %v1744_v26 = vpack.c.bf16 %v1740_v5, %v1739_v1 }
 0x67f   : > { %v2098_v23 = vld [vmem:[#allocation2 + $0x10] sm:$0xf]  ;;  %v2124_v7 = vld [vmem:[#allocation2 + $0x14] sm:$0xf] }
 0x680   : > { %1748 = vst [vmem:[#allocation2 + $0x18] sm:$0xff] %v1744_v26 }
 0x687   : > { %v2125_v25 = vld [vmem:[#allocation2 + $0x14] sm:$0xf0]  ;;  %v2100_v9 = vld [vmem:[#allocation2 + $0x18] sm:$0xf0] }
 0x688   : > { %v2099_v63 = vor.u32 %v2125_v25, %v2098_v23  ;;  %v2103_v43 = vor.u32 %v2124_v7, %v2100_v9 }
 0x68a   : > { %1823 = vmatpush.bf16.msra.mxu0 %v2099_v63  ;;  %1842 = vmatpush.bf16.msra.mxu1 %v2103_v43 }
 0x68e   : > { %1824 = vmatpush.bf16.msra.mxu0 %v2091_v37  ;;  %1843 = vmatpush.bf16.msra.mxu1 %v2095_v24 }
 0x691   : > { %2104 = vmatmul.msk.bf16.vlgmr.msra.gmra.mxu0 %vm402_vm0, %v2120_v18  ;;  %2106 = vmatmul.msk.bf16.vlgmr.msra.gmra.mxu1 %vm402_vm0, %v2120_v18 }
 0x6a1   : > { %2105 = vmatmul.msk.bf16.gmra.mxu0 %vm402_vm0, %v2121_v15  ;;  %2107 = vmatmul.msk.bf16.gmra.mxu1 %vm402_vm0, %v2121_v15 }
 0x70e   : > { %v1826_v59 = vpop.f32.mrf.mxu0  ;;  %v1845_v56 = vpop.f32.mrf.mxu1 }
 0x70f   : > { %v1827_v12 = vadd.f32 %v1826_v59, %v1764_v6  ;;  %v1846_v27 = vadd.f32 %v1845_v56, %v1764_v6 }
 0x711   : > { %v1855_v48 = vadd.f32 %v2357_v28, %v1827_v12  ;;  %v1856_v49 = vadd.f32 %v2358_v55, %v1846_v27 }
 0x713   : > { %1863 = vst [vmem:[%s3521_s21] sm:$0xff] %v1855_v48 }
 0x714   : > { %1864 = vst [vmem:[%s3521_s21 + $0x8] sm:$0xff] %v1856_v49 }
 0x716   : > { %v1828_v51 = vpop.f32.mrf.mxu0  ;;  %v1847_v20 = vpop.f32.mrf.mxu1 }
 0x717   : > { %v1829_v46 = vadd.f32 %v1828_v51, %v1769_v4  ;;  %v1848_v11 = vadd.f32 %v1847_v20, %v1769_v4 }
 0x719   : > { %v1857_v33 = vadd.f32 %v2359_v40, %v1829_v46  ;;  %v1858_v35 = vadd.f32 %v2360_v3, %v1848_v11 }
 0x71b   : > { %1865 = vst [vmem:[%s3521_s21 + $0x10] sm:$0xff] %v1857_v33 }
 0x71c   : > { %1866 = vst [vmem:[%s3521_s21 + $0x18] sm:$0xff] %v1858_v35 }
 0x71e   : > { %v1831_v62 = vpop.f32.mrf.mxu0  ;;  %v1850_v16 = vpop.f32.mrf.mxu1 }
 0x71f   : > { %v1832_v53 = vadd.f32 %v1831_v62, %v1774_v58  ;;  %v1851_v61 = vadd.f32 %v1850_v16, %v1774_v58 }
 0x721   : > { %v1859_v19 = vadd.f32 %v2361_v0, %v1832_v53  ;;  %v1860_v50 = vadd.f32 %v2362_v41, %v1851_v61 }
 0x723   : > { %1867 = vst [vmem:[%s3521_s21 + $0x20] sm:$0xff] %v1859_v19 }
 0x724   : > { %1868 = vst [vmem:[%s3521_s21 + $0x28] sm:$0xff] %v1860_v50 }
 0x726   : > { %v1833_v13 = vpop.f32.mrf.mxu0  ;;  %v1852_v10 = vpop.f32.mrf.mxu1 }
 0x727   : > { %v1834_v22 = vadd.f32 %v1833_v13, %v1779_v57  ;;  %v1853_v30 = vadd.f32 %v1852_v10, %v1779_v57 }
 0x729   : > { %v1861_v8 = vadd.f32 %v2363_v60, %v1834_v22  ;;  %v1862_v34 = vadd.f32 %v2364_v54, %v1853_v30 }
 0x72b   : > { %1869 = vst [vmem:[%s3521_s21 + $0x30] sm:$0xff] %v1861_v8 }
 0x72c   : > { %1870 = vst [vmem:[%s3521_s21 + $0x38] sm:$0xff] %v1862_v34 }
 0x72d   : > { %2452 = shalt.err (!%p2449_p9)
}
 0x72e   : > { %s2520_s24 = smov 256   ;;  %s2521_s14 = smov 16  }
 0x72f   : > { %2139 = dma.vmem_to_hbm [thread:$0]  (%p2607_p4), %s1887_s19, 1024, %s1889_s20, %s1872_s30, %s2520_s24, %s2520_s24, %s2521_s14  }
 0x730 PF: > { %p2156_p10 = scmp.ge.s32.totalorder %s2511_s10, 2  ;;  %s1903_s21 = sand.u32 1, %s2491_s27  }
 0x731   : > { %s1904_s2 = scalar_lea.sflag [#allocation5], %s1903_s21 }
 0x732   : > { %p2149_p11 = pnand %p2156_p10, %p2614_p8 }
 0x734   : > { %p2150_p12 = pneg %p2149_p11 }
 0x736   : > { %2486 = dma.done.wait (%p2150_p12), %s1904_s2, 1024  }
 0x737   : > { %2488 = vsyncadd (%p2150_p12), %s1904_s2, 4294966272  ;;  %s23_s10 = sadd.s32 1, %s2511_s10   ;;  %s3696_s15 = sld [smem:[#allocation12_spill]] }
 0x738   : > { %p20_p13 = scmp.ge.s32.totalorder %s23_s10, 4   ;;  %s3697_s27 = smov %s2495_s28 }
 0x739   : > { %s3698_s28 = smov %s2499_s29  ;;  %s3699_s29 = smov %s2620_s18 }
 0x73a   : > { %s3700_s30 = smov %s2507_s9  ;;  %22 = sbr.rel (!%p20_p13) target bundleno = 8 (0x8), region = 96 }
 0x73d   : > { %s3701_s9 = smov %s3696_s15 }
 0x73f   :  { %1910 = vsyncpa [#allocation4], 1 }
 0x740   :  { %1912 = vsyncpa [#allocation4 + $0x1], 1 }
 0x741   :  { %1913 = vsyncpa [#allocation7], 1 }
 0x742   :  { %1914 = vsyncpa [#allocation5], 1 }
 0x743   :  { %1916 = vsyncpa [#allocation5 + $0x1], 1 }

</bundles_post_ra>
